<compile_context>
chip_gen: v7x
topology: tpu7x:2x2x1
jax: 0.10.0
libtpu: 0.0.40
codegen_flags: <defaults>
</compile_context>

<pallas_src>
import functools

import jax
import jax.numpy as jnp
from jax.experimental import pallas as pl
from jax.experimental.pallas import tpu as pltpu


# bf16 MXU operands with f32 accumulation (set to None for exact f32 matmuls).
MM_DTYPE = jnp.bfloat16

WEIGHT_NAMES = ["ln1_g", "ln1_b", "wq", "wk", "wv", "wo", "bo",
                "ln2_g", "ln2_b", "w1", "b1", "w2", "b2"]


# ----------------------------- kernel helpers ------------------------------

def _layernorm(x, gamma, beta, eps):
    # x: (R, D), gamma/beta: (1, D); biased variance like torch.nn.LayerNorm.
    mu = jnp.mean(x, axis=-1, keepdims=True)
    var = jnp.mean((x - mu) ** 2, axis=-1, keepdims=True)
    return (x - mu) * jax.lax.rsqrt(var + eps) * gamma + beta


def _erf_poly(x):
    # Abramowitz & Stegun 7.1.26 rational approximation of erf, |err| <= 1.5e-7
    # (≈ f32 epsilon).  Uses only exp / mul / add / reciprocal, so it lowers on
    # every TPU generation without relying on an erf primitive in Mosaic.
    p = 0.3275911
    a1, a2, a3, a4, a5 = (0.254829592, -0.284496736, 1.421413741,
                          -1.453152027, 1.061405429)
    ax = jnp.abs(x)
    t = pl.reciprocal(1.0 + p * ax)            # exact (Newton-refined) reciprocal
    poly = ((((a5 * t + a4) * t + a3) * t + a2) * t + a1) * t
    y = 1.0 - poly * jnp.exp(-ax * ax)
    return jnp.where(x < 0, -y, y)


def _gelu_exact(x):
    # torch.nn.GELU() default (erf form).
    return 0.5 * x * (1.0 + _erf_poly(x * 0.7071067811865476))


# ------------------------- fused transformer kernel ------------------------

def _fused_kernel(x_ref,
                  ln1_g_ref, ln1_b_ref, wq_ref, wk_ref, wv_ref, wo_ref, bo_ref,
                  ln2_g_ref, ln2_b_ref, w1_ref, b1_ref, w2_ref, b2_ref,
                  lnf_g_ref, lnf_b_ref,
                  o_ref, act_ref,
                  *, seq, dim, heads, dim_head, ff_eps, mm_dtype):
    l = pl.program_id(1)
    n_layers = pl.num_programs(1)
    inner = heads * dim_head
    scale = dim_head ** -0.5

    # Load this batch element into the carried f32 activation on the first layer.
    # (Relies on the layer axis being the innermost, "arbitrary" grid axis.)
    @pl.when(l == 0)
    def _():
        act_ref[...] = x_ref[...].reshape(seq, dim).astype(jnp.float32)

    x = act_ref[...]                                         # (N, D) f32

    def mm(a, w):
        if mm_dtype is not None:
            a = a.astype(mm_dtype)
            w = w.astype(mm_dtype)
        return jnp.dot(a, w, preferred_element_type=jnp.float32)

    # -------------------- Attention (no residual, per the PyTorch code) ----
    xn = _layernorm(x, ln1_g_ref[0], ln1_b_ref[0], 1e-5)
    # Softmax scale folded into q: scales N*inner elements instead of heads*N*N.
    q = mm(xn, wq_ref[0]) * scale                            # (N, inner) f32
    k = mm(xn, wk_ref[0])
    v = mm(xn, wv_ref[0])

    def to_heads(t):
        # (N, inner) -> (heads, N, dh): one reshape + one lane-aware relayout.
        t = t.reshape(seq, heads, dim_head)
        t = pltpu.einshape("nhd->hnd", t)
        if mm_dtype is not None:
            t = t.astype(mm_dtype)
        return t

    q3, k3, v3 = to_heads(q), to_heads(k), to_heads(v)

    # Leading-batch 3-D einsums over the head axis (no per-head Python loop).
    s = jnp.einsum('hnd,hmd->hnm', q3, k3,
                   preferred_element_type=jnp.float32)       # (h, N, N) f32
    s = s - jnp.max(s, axis=-1, keepdims=True)
    e = jnp.exp(s)
    r = pl.reciprocal(jnp.sum(e, axis=-1, keepdims=True),
                      approx=mm_dtype is not None)           # (h, N, 1) f32
    e_c = e.astype(mm_dtype) if mm_dtype is not None else e
    out3 = jnp.einsum('hnm,hmd->hnd', e_c, v3,
                      preferred_element_type=jnp.float32)    # (h, N, dh) f32
    # Normalize AFTER attn@V: heads*N*dh multiplies instead of heads*N*N.
    out3 = out3 * r

    heads_cat = pltpu.einshape("hnd->nhd", out3).reshape(seq, inner)
    attn_out = mm(heads_cat, wo_ref[0]) + bo_ref[0]          # (N, D) f32

    # -------------------- FeedForward + residual ---------------------------
    # ff_eps == mlp_size reproduces nn.LayerNorm(dim, hidden_dim) (eps quirk).
    y = _layernorm(attn_out, ln2_g_ref[0], ln2_b_ref[0], ff_eps)
    y = mm(y, w1_ref[0]) + b1_ref[0]
    y = _gelu_exact(y)                                       # exact erf GELU (torch default)
    y = mm(y, w2_ref[0]) + b2_ref[0]
    new_x = y + attn_out

    act_ref[...] = new_x

    # Final LayerNorm folded into the last layer iteration.
    @pl.when(l == n_layers - 1)
    def _():
        out = _layernorm(new_x, lnf_g_ref[...], lnf_b_ref[...], 1e-5)
        o_ref[...] = out.reshape(1, seq, dim).astype(o_ref.dtype)


# ------------------------------ JAX wrapper ---------------------------------

def _vmem_limit_bytes():
    # Generation-dependent scoped-VMEM limit with headroom for Mosaic internal
    # scratch: ~51 MiB on v7x (64 MiB physical), ~100 MiB on v5e/v6e (128 MiB).
    cap = 64 * 1024 * 1024   # conservative fallback = smallest physical VMEM (v7x)
    try:
        info = pltpu.get_tpu_info()
        cap = int(getattr(info, "vmem_capacity_bytes", cap))
    except Exception:
        pass
    return min((cap * 4) // 5, 100 * 1024 * 1024)


def transformer_forward(x, params, *, heads, dim_head, mlp_size, mm_dtype=MM_DTYPE):
    B, N, D = x.shape
    L = params["wq"].shape[0]
    ff_eps = float(mlp_size)   # reproduces nn.LayerNorm(dim, hidden_dim): eps = mlp_size

    grid = (B, L)              # (parallel batch elements, sequential layers)

    kernel = functools.partial(_fused_kernel, seq=N, dim=D, heads=heads,
                               dim_head=dim_head, ff_eps=ff_eps, mm_dtype=mm_dtype)

    def layer_spec(a):
        # One layer slice per grid step, following the (arbitrary) layer axis.
        nd = a.ndim
        return pl.BlockSpec((1,) + tuple(a.shape[1:]),
                            lambda b, l, _nd=nd: (l,) + (0,) * (_nd - 1))

    def const_spec(a):
        nd = a.ndim
        return pl.BlockSpec(tuple(a.shape),
                            lambda b, l, _nd=nd: (0,) * _nd)

    in_specs = ([pl.BlockSpec((1, N, D), lambda b, l: (b, 0, 0))]
                + [layer_spec(params[k]) for k in WEIGHT_NAMES]
                + [const_spec(params["lnf_g"]), const_spec(params["lnf_b"])])

    return pl.pallas_call(
        kernel,
        out_shape=jax.ShapeDtypeStruct((B, N, D), x.dtype),
        grid=grid,
        in_specs=in_specs,
        out_specs=pl.BlockSpec((1, N, D), lambda b, l: (b, 0, 0)),
        scratch_shapes=[pltpu.VMEM((N, D), jnp.float32)],   # activation carried over layers
        compiler_params=pltpu.CompilerParams(
            dimension_semantics=("parallel", "arbitrary"),
            vmem_limit_bytes=_vmem_limit_bytes()),
    )(x, *[params[k] for k in WEIGHT_NAMES], params["lnf_g"], params["lnf_b"])


# --------------------------- deterministic params ---------------------------

def init_params(key, *, dim, layers, heads, dim_head, mlp_size, weight_dtype=None):
    # All per-layer weights stacked along a leading (layers,) axis so a single
    # pallas_call streams them via the layer grid axis.  to_qkv is split into
    # wq/wk/wv (head-major columns) so q/k/v leave their matmul already
    # per-head contiguous — no 3*inner column slicing in the kernel.
    if weight_dtype is None:
        weight_dtype = jnp.bfloat16 if MM_DTYPE is not None else jnp.float32
    inner = heads * dim_head
    keys = jax.random.split(key, 8)

    def normal(k, shape, s):
        return s * jax.random.normal(k, shape, jnp.float32)

    params = {
        "ln1_g": jnp.ones((layers, 1, dim), jnp.float32),
        "ln1_b": jnp.zeros((layers, 1, dim), jnp.float32),
        "wq":    normal(keys[0], (layers, dim, inner), 0.05).astype(weight_dtype),
        "wk":    normal(keys[1], (layers, dim, inner), 0.05).astype(weight_dtype),
        "wv":    normal(keys[2], (layers, dim, inner), 0.05).astype(weight_dtype),
        "wo":    normal(keys[3], (layers, inner, dim), 0.05).astype(weight_dtype),
        "bo":    normal(keys[4], (layers, 1, dim), 0.01),
        "ln2_g": jnp.ones((layers, 1, dim), jnp.float32),
        "ln2_b": jnp.zeros((layers, 1, dim), jnp.float32),
        "w1":    normal(keys[5], (layers, dim, mlp_size), 0.05).astype(weight_dtype),
        "b1":    normal(keys[6], (layers, 1, mlp_size), 0.01),
        "w2":    normal(keys[7], (layers, mlp_size, dim), 0.05).astype(weight_dtype),
        "b2":    jnp.zeros((layers, 1, dim), jnp.float32),
        "lnf_g": jnp.ones((1, dim), jnp.float32),
        "lnf_b": jnp.zeros((1, dim), jnp.float32),
    }
    return params


# ----------------------------------- main -----------------------------------

if __name__ == "__main__":
    # Small config consistent with Transformer(dim, layers, heads, hidden_size, mlp_size).
    B, N = 2, 8
    dim, layers, heads, hidden_size, mlp_size = 32, 2, 4, 16, 64

    key = jax.random.PRNGKey(0)
    key, xk = jax.random.split(key)
    x = jax.random.normal(xk, (B, N, dim), jnp.float32)

    params = init_params(key, dim=dim, layers=layers, heads=heads,
                         dim_head=hidden_size, mlp_size=mlp_size)

    out = transformer_forward(x, params,
                              heads=heads, dim_head=hidden_size,
                              mlp_size=mlp_size)
    out = jax.block_until_ready(out)
    assert out.shape == (B, N, dim) and out.dtype == jnp.float32
    assert bool(jnp.all(jnp.isfinite(out)))
    print("KERNEL_OK")
</pallas_src>

<mosaic_0001>
module attributes {stable_mosaic.version = 11 : i64} {
  func.func @_fused_kernel(%arg0: i32, %arg1: i32, %arg2: memref<1x8x32xf32, #tpu.memory_space<vmem>>, %arg3: memref<1x1x32xf32, #tpu.memory_space<vmem>>, %arg4: memref<1x1x32xf32, #tpu.memory_space<vmem>>, %arg5: memref<1x32x64xbf16, #tpu.memory_space<vmem>>, %arg6: memref<1x32x64xbf16, #tpu.memory_space<vmem>>, %arg7: memref<1x32x64xbf16, #tpu.memory_space<vmem>>, %arg8: memref<1x64x32xbf16, #tpu.memory_space<vmem>>, %arg9: memref<1x1x32xf32, #tpu.memory_space<vmem>>, %arg10: memref<1x1x32xf32, #tpu.memory_space<vmem>>, %arg11: memref<1x1x32xf32, #tpu.memory_space<vmem>>, %arg12: memref<1x32x64xbf16, #tpu.memory_space<vmem>>, %arg13: memref<1x1x64xf32, #tpu.memory_space<vmem>>, %arg14: memref<1x64x32xbf16, #tpu.memory_space<vmem>>, %arg15: memref<1x1x32xf32, #tpu.memory_space<vmem>>, %arg16: memref<1x32xf32, #tpu.memory_space<vmem>>, %arg17: memref<1x32xf32, #tpu.memory_space<vmem>>, %arg18: memref<1x8x32xf32, #tpu.memory_space<vmem>>, %arg19: memref<8x32xf32, #tpu.memory_space<vmem>>) attributes {dimension_semantics = [#tpu.dimension_semantics<parallel>, #tpu.dimension_semantics<arbitrary>], iteration_bounds = array<i64: 2, 2>, scalar_prefetch = 0 : i64, scratch_operands = 1 : i64, tpu.core_type = #tpu.core_type<tc>, window_params = [{transform_indices = @transform_0, window_bounds = array<i64: 1, 8, 32>}, {transform_indices = @transform_1, window_bounds = array<i64: 1, 1, 32>}, {transform_indices = @transform_2, window_bounds = array<i64: 1, 1, 32>}, {transform_indices = @transform_3, window_bounds = array<i64: 1, 32, 64>}, {transform_indices = @transform_4, window_bounds = array<i64: 1, 32, 64>}, {transform_indices = @transform_5, window_bounds = array<i64: 1, 32, 64>}, {transform_indices = @transform_6, window_bounds = array<i64: 1, 64, 32>}, {transform_indices = @transform_7, window_bounds = array<i64: 1, 1, 32>}, {transform_indices = @transform_8, window_bounds = array<i64: 1, 1, 32>}, {transform_indices = @transform_9, window_bounds = array<i64: 1, 1, 32>}, {transform_indices = @transform_10, window_bounds = array<i64: 1, 32, 64>}, {transform_indices = @transform_11, window_bounds = array<i64: 1, 1, 64>}, {transform_indices = @transform_12, window_bounds = array<i64: 1, 64, 32>}, {transform_indices = @transform_13, window_bounds = array<i64: 1, 1, 32>}, {pipeline_mode = #tpu.pipeline_mode<synchronous>, transform_indices = @transform_14, window_bounds = array<i64: 1, 32>}, {pipeline_mode = #tpu.pipeline_mode<synchronous>, transform_indices = @transform_15, window_bounds = array<i64: 1, 32>}, {transform_indices = @transform_16, window_bounds = array<i64: 1, 8, 32>}]} {
    %c0_i32 = arith.constant 0 : i32
    %0 = arith.cmpi eq, %arg1, %c0_i32 : i32
    %1 = arith.extui %0 : i1 to i32
    %c0_i32_0 = arith.constant 0 : i32
    %2 = arith.cmpi ne, %1, %c0_i32_0 : i32
    scf.if %2 {
      %c0_78 = arith.constant 0 : index
      %c0_79 = arith.constant 0 : index
      %c0_80 = arith.constant 0 : index
      %162 = vector.load %arg2[%c0_78, %c0_79, %c0_80] : memref<1x8x32xf32, #tpu.memory_space<vmem>>, vector<1x8x32xf32>
      %163 = vector.shape_cast %162 : vector<1x8x32xf32> to vector<8x32xf32>
      %c0_81 = arith.constant 0 : index
      %c0_82 = arith.constant 0 : index
      %164 = vector.load %arg19[%c0_81, %c0_82] : memref<8x32xf32, #tpu.memory_space<vmem>>, vector<8x32xf32>
      tpu.vector_store %arg19[%c0_81, %c0_82], %163 {strides = array<i32>} : memref<8x32xf32, #tpu.memory_space<vmem>>, vector<8x32xf32>,
    } else {
    }
    %c0 = arith.constant 0 : index
    %c0_1 = arith.constant 0 : index
    %3 = vector.load %arg19[%c0, %c0_1] : memref<8x32xf32, #tpu.memory_space<vmem>>, vector<8x32xf32>
    %c0_2 = arith.constant 0 : index
    %c0_3 = arith.constant 0 : index
    %c0_4 = arith.constant 0 : index
    %4 = vector.load %arg3[%c0_2, %c0_3, %c0_4] : memref<1x1x32xf32, #tpu.memory_space<vmem>>, vector<1x1x32xf32>
    %5 = vector.shape_cast %4 : vector<1x1x32xf32> to vector<1x32xf32>
    %c0_5 = arith.constant 0 : index
    %c0_6 = arith.constant 0 : index
    %c0_7 = arith.constant 0 : index
    %6 = vector.load %arg4[%c0_5, %c0_6, %c0_7] : memref<1x1x32xf32, #tpu.memory_space<vmem>>, vector<1x1x32xf32>
    %7 = vector.shape_cast %6 : vector<1x1x32xf32> to vector<1x32xf32>
    %cst = arith.constant dense<0.000000e+00> : vector<8xf32>
    %8 = vector.multi_reduction <add>, %3, %cst [1] : vector<8x32xf32> to vector<8xf32>
    %9 = vector.shape_cast %8 : vector<8xf32> to vector<8x1xf32>
    %cst_8 = arith.constant 3.200000e+01 : f32
    %10 = vector.broadcast %cst_8 : f32 to vector<8x1xf32>
    %11 = arith.divf %9, %10 : vector<8x1xf32>
    %12 = vector.broadcast %11 : vector<8x1xf32> to vector<8x32xf32>
    %13 = arith.subf %3, %12 : vector<8x32xf32>
    %14 = arith.mulf %13, %13 : vector<8x32xf32>
    %cst_9 = arith.constant dense<0.000000e+00> : vector<8xf32>
    %15 = vector.multi_reduction <add>, %14, %cst_9 [1] : vector<8x32xf32> to vector<8xf32>
    %16 = vector.shape_cast %15 : vector<8xf32> to vector<8x1xf32>
    %cst_10 = arith.constant 3.200000e+01 : f32
    %17 = vector.broadcast %cst_10 : f32 to vector<8x1xf32>
    %18 = arith.divf %16, %17 : vector<8x1xf32>
    %19 = vector.broadcast %11 : vector<8x1xf32> to vector<8x32xf32>
    %20 = arith.subf %3, %19 : vector<8x32xf32>
    %cst_11 = arith.constant 9.99999974E-6 : f32
    %21 = vector.broadcast %cst_11 : f32 to vector<8x1xf32>
    %22 = arith.addf %18, %21 : vector<8x1xf32>
    %23 = math.rsqrt %22 : vector<8x1xf32>
    %24 = vector.broadcast %23 : vector<8x1xf32> to vector<8x32xf32>
    %25 = arith.mulf %20, %24 : vector<8x32xf32>
    %26 = vector.broadcast %5 : vector<1x32xf32> to vector<8x32xf32>
    %27 = arith.mulf %25, %26 : vector<8x32xf32>
    %28 = vector.broadcast %7 : vector<1x32xf32> to vector<8x32xf32>
    %29 = arith.addf %27, %28 : vector<8x32xf32>
    %c0_12 = arith.constant 0 : index
    %c0_13 = arith.constant 0 : index
    %c0_14 = arith.constant 0 : index
    %30 = vector.load %arg5[%c0_12, %c0_13, %c0_14] : memref<1x32x64xbf16, #tpu.memory_space<vmem>>, vector<1x32x64xbf16>
    %31 = vector.shape_cast %30 : vector<1x32x64xbf16> to vector<32x64xbf16>
    %32 = arith.truncf %29 : vector<8x32xf32> to vector<8x32xbf16>
    %cst_15 = arith.constant dense<0.000000e+00> : vector<8x64xf32>
    %33 = tpu.matmul %32, %31, %cst_15 {dimension_numbers = #tpu.dot_dimension_numbers<[1], [0], [0], [1], [0, 0, 1, 1], [], []>} : vector<8x32xbf16>, vector<32x64xbf16>, vector<8x64xf32> -> vector<8x64xf32>
    %cst_16 = arith.constant 2.500000e-01 : f32
    %34 = vector.broadcast %cst_16 : f32 to vector<8x64xf32>
    %35 = arith.mulf %33, %34 : vector<8x64xf32>
    %c0_17 = arith.constant 0 : index
    %c0_18 = arith.constant 0 : index
    %c0_19 = arith.constant 0 : index
    %36 = vector.load %arg6[%c0_17, %c0_18, %c0_19] : memref<1x32x64xbf16, #tpu.memory_space<vmem>>, vector<1x32x64xbf16>
    %37 = vector.shape_cast %36 : vector<1x32x64xbf16> to vector<32x64xbf16>
    %38 = arith.truncf %29 : vector<8x32xf32> to vector<8x32xbf16>
    %cst_20 = arith.constant dense<0.000000e+00> : vector<8x64xf32>
    %39 = tpu.matmul %38, %37, %cst_20 {dimension_numbers = #tpu.dot_dimension_numbers<[1], [0], [0], [1], [0, 0, 1, 1], [], []>} : vector<8x32xbf16>, vector<32x64xbf16>, vector<8x64xf32> -> vector<8x64xf32>
    %c0_21 = arith.constant 0 : index
    %c0_22 = arith.constant 0 : index
    %c0_23 = arith.constant 0 : index
    %40 = vector.load %arg7[%c0_21, %c0_22, %c0_23] : memref<1x32x64xbf16, #tpu.memory_space<vmem>>, vector<1x32x64xbf16>
    %41 = vector.shape_cast %40 : vector<1x32x64xbf16> to vector<32x64xbf16>
    %42 = arith.truncf %29 : vector<8x32xf32> to vector<8x32xbf16>
    %cst_24 = arith.constant dense<0.000000e+00> : vector<8x64xf32>
    %43 = tpu.matmul %42, %41, %cst_24 {dimension_numbers = #tpu.dot_dimension_numbers<[1], [0], [0], [1], [0, 0, 1, 1], [], []>} : vector<8x32xbf16>, vector<32x64xbf16>, vector<8x64xf32> -> vector<8x64xf32>
    %44 = vector.shape_cast %35 : vector<8x64xf32> to vector<8x4x16xf32>
    %45 = tpu.transpose %44, [1, 0, 2] : vector<8x4x16xf32> -> vector<4x8x16xf32>
    %46 = arith.truncf %45 : vector<4x8x16xf32> to vector<4x8x16xbf16>
    %47 = vector.shape_cast %39 : vector<8x64xf32> to vector<8x4x16xf32>
    %48 = tpu.transpose %47, [1, 0, 2] : vector<8x4x16xf32> -> vector<4x8x16xf32>
    %49 = arith.truncf %48 : vector<4x8x16xf32> to vector<4x8x16xbf16>
    %50 = vector.shape_cast %43 : vector<8x64xf32> to vector<8x4x16xf32>
    %51 = tpu.transpose %50, [1, 0, 2] : vector<8x4x16xf32> -> vector<4x8x16xf32>
    %52 = arith.truncf %51 : vector<4x8x16xf32> to vector<4x8x16xbf16>
    "tpu.trace_start"() <{level = 10 : i32, message = "hnd,hmd->hnm"}> : () -> ()
    %cst_25 = arith.constant dense<0.000000e+00> : vector<4x8x8xf32>
    %53 = tpu.matmul %46, %49, %cst_25 {dimension_numbers = #tpu.dot_dimension_numbers<[2], [2], [1], [1], [0, 0, 0, 1, 1, 1], [0], [0]>} : vector<4x8x16xbf16>, vector<4x8x16xbf16>, vector<4x8x8xf32> -> vector<4x8x8xf32>
    "tpu.trace_stop"() : () -> ()
    %cst_26 = arith.constant dense<0xFF800000> : vector<4x8xf32>
    %54 = vector.multi_reduction <maximumf>, %53, %cst_26 [2] : vector<4x8x8xf32> to vector<4x8xf32>
    %55 = vector.shape_cast %54 : vector<4x8xf32> to vector<4x8x1xf32>
    %56 = vector.broadcast %55 : vector<4x8x1xf32> to vector<4x8x8xf32>
    %57 = arith.subf %53, %56 : vector<4x8x8xf32>
    %58 = math.exp %57 : vector<4x8x8xf32>
    %cst_27 = arith.constant dense<0.000000e+00> : vector<4x8xf32>
    %59 = vector.multi_reduction <add>, %58, %cst_27 [2] : vector<4x8x8xf32> to vector<4x8xf32>
    %60 = vector.shape_cast %59 : vector<4x8xf32> to vector<4x8x1xf32>
    %61 = tpu.reciprocal %60 {approx = true} : vector<4x8x1xf32> -> vector<4x8x1xf32>
    %62 = arith.truncf %58 : vector<4x8x8xf32> to vector<4x8x8xbf16>
    "tpu.trace_start"() <{level = 10 : i32, message = "hnm,hmd->hnd"}> : () -> ()
    %cst_28 = arith.constant dense<0.000000e+00> : vector<4x8x16xf32>
    %63 = tpu.matmul %62, %52, %cst_28 {dimension_numbers = #tpu.dot_dimension_numbers<[2], [1], [1], [2], [0, 0, 0, 1, 1, 2], [0], [0]>} : vector<4x8x8xbf16>, vector<4x8x16xbf16>, vector<4x8x16xf32> -> vector<4x8x16xf32>
    "tpu.trace_stop"() : () -> ()
    %64 = vector.broadcast %61 : vector<4x8x1xf32> to vector<4x8x16xf32>
    %65 = arith.mulf %63, %64 : vector<4x8x16xf32>
    %66 = tpu.transpose %65, [1, 0, 2] : vector<4x8x16xf32> -> vector<8x4x16xf32>
    %67 = vector.shape_cast %66 : vector<8x4x16xf32> to vector<8x64xf32>
    %c0_29 = arith.constant 0 : index
    %c0_30 = arith.constant 0 : index
    %c0_31 = arith.constant 0 : index
    %68 = vector.load %arg8[%c0_29, %c0_30, %c0_31] : memref<1x64x32xbf16, #tpu.memory_space<vmem>>, vector<1x64x32xbf16>
    %69 = vector.shape_cast %68 : vector<1x64x32xbf16> to vector<64x32xbf16>
    %70 = arith.truncf %67 : vector<8x64xf32> to vector<8x64xbf16>
    %cst_32 = arith.constant dense<0.000000e+00> : vector<8x32xf32>
    %71 = tpu.matmul %70, %69, %cst_32 {dimension_numbers = #tpu.dot_dimension_numbers<[1], [0], [0], [1], [0, 0, 1, 1], [], []>} : vector<8x64xbf16>, vector<64x32xbf16>, vector<8x32xf32> -> vector<8x32xf32>
    %c0_33 = arith.constant 0 : index
    %c0_34 = arith.constant 0 : index
    %c0_35 = arith.constant 0 : index
    %72 = vector.load %arg9[%c0_33, %c0_34, %c0_35] : memref<1x1x32xf32, #tpu.memory_space<vmem>>, vector<1x1x32xf32>
    %73 = vector.shape_cast %72 : vector<1x1x32xf32> to vector<1x32xf32>
    %74 = vector.broadcast %73 : vector<1x32xf32> to vector<8x32xf32>
    %75 = arith.addf %71, %74 : vector<8x32xf32>
    %c0_36 = arith.constant 0 : index
    %c0_37 = arith.constant 0 : index
    %c0_38 = arith.constant 0 : index
    %76 = vector.load %arg10[%c0_36, %c0_37, %c0_38] : memref<1x1x32xf32, #tpu.memory_space<vmem>>, vector<1x1x32xf32>
    %77 = vector.shape_cast %76 : vector<1x1x32xf32> to vector<1x32xf32>
    %c0_39 = arith.constant 0 : index
    %c0_40 = arith.constant 0 : index
    %c0_41 = arith.constant 0 : index
    %78 = vector.load %arg11[%c0_39, %c0_40, %c0_41] : memref<1x1x32xf32, #tpu.memory_space<vmem>>, vector<1x1x32xf32>
    %79 = vector.shape_cast %78 : vector<1x1x32xf32> to vector<1x32xf32>
    %cst_42 = arith.constant dense<0.000000e+00> : vector<8xf32>
    %80 = vector.multi_reduction <add>, %75, %cst_42 [1] : vector<8x32xf32> to vector<8xf32>
    %81 = vector.shape_cast %80 : vector<8xf32> to vector<8x1xf32>
    %cst_43 = arith.constant 3.200000e+01 : f32
    %82 = vector.broadcast %cst_43 : f32 to vector<8x1xf32>
    %83 = arith.divf %81, %82 : vector<8x1xf32>
    %84 = vector.broadcast %83 : vector<8x1xf32> to vector<8x32xf32>
    %85 = arith.subf %75, %84 : vector<8x32xf32>
    %86 = arith.mulf %85, %85 : vector<8x32xf32>
    %cst_44 = arith.constant dense<0.000000e+00> : vector<8xf32>
    %87 = vector.multi_reduction <add>, %86, %cst_44 [1] : vector<8x32xf32> to vector<8xf32>
    %88 = vector.shape_cast %87 : vector<8xf32> to vector<8x1xf32>
    %cst_45 = arith.constant 3.200000e+01 : f32
    %89 = vector.broadcast %cst_45 : f32 to vector<8x1xf32>
    %90 = arith.divf %88, %89 : vector<8x1xf32>
    %91 = vector.broadcast %83 : vector<8x1xf32> to vector<8x32xf32>
    %92 = arith.subf %75, %91 : vector<8x32xf32>
    %cst_46 = arith.constant 6.400000e+01 : f32
    %93 = vector.broadcast %cst_46 : f32 to vector<8x1xf32>
    %94 = arith.addf %90, %93 : vector<8x1xf32>
    %95 = math.rsqrt %94 : vector<8x1xf32>
    %96 = vector.broadcast %95 : vector<8x1xf32> to vector<8x32xf32>
    %97 = arith.mulf %92, %96 : vector<8x32xf32>
    %98 = vector.broadcast %77 : vector<1x32xf32> to vector<8x32xf32>
    %99 = arith.mulf %97, %98 : vector<8x32xf32>
    %100 = vector.broadcast %79 : vector<1x32xf32> to vector<8x32xf32>
    %101 = arith.addf %99, %100 : vector<8x32xf32>
    %c0_47 = arith.constant 0 : index
    %c0_48 = arith.constant 0 : index
    %c0_49 = arith.constant 0 : index
    %102 = vector.load %arg12[%c0_47, %c0_48, %c0_49] : memref<1x32x64xbf16, #tpu.memory_space<vmem>>, vector<1x32x64xbf16>
    %103 = vector.shape_cast %102 : vector<1x32x64xbf16> to vector<32x64xbf16>
    %104 = arith.truncf %101 : vector<8x32xf32> to vector<8x32xbf16>
    %cst_50 = arith.constant dense<0.000000e+00> : vector<8x64xf32>
    %105 = tpu.matmul %104, %103, %cst_50 {dimension_numbers = #tpu.dot_dimension_numbers<[1], [0], [0], [1], [0, 0, 1, 1], [], []>} : vector<8x32xbf16>, vector<32x64xbf16>, vector<8x64xf32> -> vector<8x64xf32>
    %c0_51 = arith.constant 0 : index
    %c0_52 = arith.constant 0 : index
    %c0_53 = arith.constant 0 : index
    %106 = vector.load %arg13[%c0_51, %c0_52, %c0_53] : memref<1x1x64xf32, #tpu.memory_space<vmem>>, vector<1x1x64xf32>
    %107 = vector.shape_cast %106 : vector<1x1x64xf32> to vector<1x64xf32>
    %108 = vector.broadcast %107 : vector<1x64xf32> to vector<8x64xf32>
    %109 = arith.addf %105, %108 : vector<8x64xf32>
    %cst_54 = arith.constant 5.000000e-01 : f32
    %110 = vector.broadcast %cst_54 : f32 to vector<8x64xf32>
    %111 = arith.mulf %110, %109 : vector<8x64xf32>
    %cst_55 = arith.constant 0.707106769 : f32
    %112 = vector.broadcast %cst_55 : f32 to vector<8x64xf32>
    %113 = arith.mulf %109, %112 : vector<8x64xf32>
    %114 = math.absf %113 : vector<8x64xf32>
    %cst_56 = arith.constant 0.327591091 : f32
    %115 = vector.broadcast %cst_56 : f32 to vector<8x64xf32>
    %116 = arith.mulf %115, %114 : vector<8x64xf32>
    %cst_57 = arith.constant 1.000000e+00 : f32
    %117 = vector.broadcast %cst_57 : f32 to vector<8x64xf32>
    %118 = arith.addf %117, %116 : vector<8x64xf32>
    %119 = tpu.reciprocal %118 : vector<8x64xf32> -> vector<8x64xf32>
    %cst_58 = arith.constant 1.06140542 : f32
    %120 = vector.broadcast %cst_58 : f32 to vector<8x64xf32>
    %121 = arith.mulf %120, %119 : vector<8x64xf32>
    %cst_59 = arith.constant -1.45315206 : f32
    %122 = vector.broadcast %cst_59 : f32 to vector<8x64xf32>
    %123 = arith.addf %121, %122 : vector<8x64xf32>
    %124 = arith.mulf %123, %119 : vector<8x64xf32>
    %cst_60 = arith.constant 1.42141378 : f32
    %125 = vector.broadcast %cst_60 : f32 to vector<8x64xf32>
    %126 = arith.addf %124, %125 : vector<8x64xf32>
    %127 = arith.mulf %126, %119 : vector<8x64xf32>
    %cst_61 = arith.constant -0.284496725 : f32
    %128 = vector.broadcast %cst_61 : f32 to vector<8x64xf32>
    %129 = arith.addf %127, %128 : vector<8x64xf32>
    %130 = arith.mulf %129, %119 : vector<8x64xf32>
    %cst_62 = arith.constant 0.254829586 : f32
    %131 = vector.broadcast %cst_62 : f32 to vector<8x64xf32>
    %132 = arith.addf %130, %131 : vector<8x64xf32>
    %133 = arith.mulf %132, %119 : vector<8x64xf32>
    %cst_63 = arith.constant 0.000000e+00 : f32
    %134 = vector.broadcast %cst_63 : f32 to vector<8x64xf32>
    %135 = arith.subf %134, %114 : vector<8x64xf32>
    %136 = arith.mulf %135, %114 : vector<8x64xf32>
    %137 = math.exp %136 : vector<8x64xf32>
    %138 = arith.mulf %133, %137 : vector<8x64xf32>
    %cst_64 = arith.constant 1.000000e+00 : f32
    %139 = vector.broadcast %cst_64 : f32 to vector<8x64xf32>
    %140 = arith.subf %139, %138 : vector<8x64xf32>
    %cst_65 = arith.constant 0.000000e+00 : f32
    %141 = vector.broadcast %cst_65 : f32 to vector<8x64xf32>
    %142 = arith.cmpf olt, %113, %141 : vector<8x64xf32>
    %cst_66 = arith.constant 0.000000e+00 : f32
    %143 = vector.broadcast %cst_66 : f32 to vector<8x64xf32>
    %144 = arith.subf %143, %140 : vector<8x64xf32>
    %145 = arith.select %142, %144, %140 : vector<8x64xi1>, vector<8x64xf32>
    %cst_67 = arith.constant 1.000000e+00 : f32
    %146 = vector.broadcast %cst_67 : f32 to vector<8x64xf32>
    %147 = arith.addf %146, %145 : vector<8x64xf32>
    %148 = arith.mulf %111, %147 : vector<8x64xf32>
    %c0_68 = arith.constant 0 : index
    %c0_69 = arith.constant 0 : index
    %c0_70 = arith.constant 0 : index
    %149 = vector.load %arg14[%c0_68, %c0_69, %c0_70] : memref<1x64x32xbf16, #tpu.memory_space<vmem>>, vector<1x64x32xbf16>
    %150 = vector.shape_cast %149 : vector<1x64x32xbf16> to vector<64x32xbf16>
    %151 = arith.truncf %148 : vector<8x64xf32> to vector<8x64xbf16>
    %cst_71 = arith.constant dense<0.000000e+00> : vector<8x32xf32>
    %152 = tpu.matmul %151, %150, %cst_71 {dimension_numbers = #tpu.dot_dimension_numbers<[1], [0], [0], [1], [0, 0, 1, 1], [], []>} : vector<8x64xbf16>, vector<64x32xbf16>, vector<8x32xf32> -> vector<8x32xf32>
    %c0_72 = arith.constant 0 : index
    %c0_73 = arith.constant 0 : index
    %c0_74 = arith.constant 0 : index
    %153 = vector.load %arg15[%c0_72, %c0_73, %c0_74] : memref<1x1x32xf32, #tpu.memory_space<vmem>>, vector<1x1x32xf32>
    %154 = vector.shape_cast %153 : vector<1x1x32xf32> to vector<1x32xf32>
    %155 = vector.broadcast %154 : vector<1x32xf32> to vector<8x32xf32>
    %156 = arith.addf %152, %155 : vector<8x32xf32>
    %157 = arith.addf %156, %75 : vector<8x32xf32>
    %c0_75 = arith.constant 0 : index
    %c0_76 = arith.constant 0 : index
    %158 = vector.load %arg19[%c0_75, %c0_76] : memref<8x32xf32, #tpu.memory_space<vmem>>, vector<8x32xf32>
    tpu.vector_store %arg19[%c0_75, %c0_76], %157 {strides = array<i32>} : memref<8x32xf32, #tpu.memory_space<vmem>>, vector<8x32xf32>,
    %c1_i32 = arith.constant 1 : i32
    %159 = arith.cmpi eq, %arg1, %c1_i32 : i32
    %160 = arith.extui %159 : i1 to i32
    %c0_i32_77 = arith.constant 0 : i32
    %161 = arith.cmpi ne, %160, %c0_i32_77 : i32
    scf.if %161 {
      %c0_78 = arith.constant 0 : index
      %c0_79 = arith.constant 0 : index
      %162 = vector.load %arg16[%c0_78, %c0_79] : memref<1x32xf32, #tpu.memory_space<vmem>>, vector<1x32xf32>
      %c0_80 = arith.constant 0 : index
      %c0_81 = arith.constant 0 : index
      %163 = vector.load %arg17[%c0_80, %c0_81] : memref<1x32xf32, #tpu.memory_space<vmem>>, vector<1x32xf32>
      %cst_82 = arith.constant dense<0.000000e+00> : vector<8xf32>
      %164 = vector.multi_reduction <add>, %157, %cst_82 [1] : vector<8x32xf32> to vector<8xf32>
      %165 = vector.shape_cast %164 : vector<8xf32> to vector<8x1xf32>
      %cst_83 = arith.constant 3.200000e+01 : f32
      %166 = vector.broadcast %cst_83 : f32 to vector<8x1xf32>
      %167 = arith.divf %165, %166 : vector<8x1xf32>
      %168 = vector.broadcast %167 : vector<8x1xf32> to vector<8x32xf32>
      %169 = arith.subf %157, %168 : vector<8x32xf32>
      %170 = arith.mulf %169, %169 : vector<8x32xf32>
      %cst_84 = arith.constant dense<0.000000e+00> : vector<8xf32>
      %171 = vector.multi_reduction <add>, %170, %cst_84 [1] : vector<8x32xf32> to vector<8xf32>
      %172 = vector.shape_cast %171 : vector<8xf32> to vector<8x1xf32>
      %cst_85 = arith.constant 3.200000e+01 : f32
      %173 = vector.broadcast %cst_85 : f32 to vector<8x1xf32>
      %174 = arith.divf %172, %173 : vector<8x1xf32>
      %175 = vector.broadcast %167 : vector<8x1xf32> to vector<8x32xf32>
      %176 = arith.subf %157, %175 : vector<8x32xf32>
      %cst_86 = arith.constant 9.99999974E-6 : f32
      %177 = vector.broadcast %cst_86 : f32 to vector<8x1xf32>
      %178 = arith.addf %174, %177 : vector<8x1xf32>
      %179 = math.rsqrt %178 : vector<8x1xf32>
      %180 = vector.broadcast %179 : vector<8x1xf32> to vector<8x32xf32>
      %181 = arith.mulf %176, %180 : vector<8x32xf32>
      %182 = vector.broadcast %162 : vector<1x32xf32> to vector<8x32xf32>
      %183 = arith.mulf %181, %182 : vector<8x32xf32>
      %184 = vector.broadcast %163 : vector<1x32xf32> to vector<8x32xf32>
      %185 = arith.addf %183, %184 : vector<8x32xf32>
      %186 = vector.shape_cast %185 : vector<8x32xf32> to vector<1x8x32xf32>
      %c0_87 = arith.constant 0 : index
      %c0_88 = arith.constant 0 : index
      %c0_89 = arith.constant 0 : index
      %187 = vector.load %arg18[%c0_87, %c0_88, %c0_89] : memref<1x8x32xf32, #tpu.memory_space<vmem>>, vector<1x8x32xf32>
      tpu.vector_store %arg18[%c0_87, %c0_88, %c0_89], %186 {strides = array<i32>} : memref<1x8x32xf32, #tpu.memory_space<vmem>>, vector<1x8x32xf32>,
    } else {
    }
    return
  }
  func.func @transform_0(%arg0: i32, %arg1: i32) -> (i32, i32, i32) {
    %c0_i32 = arith.constant 0 : i32
    %c0_i32_0 = arith.constant 0 : i32
    %c0_i32_1 = arith.constant 0 : i32
    return %arg0, %c0_i32, %c0_i32_0 : i32, i32, i32
  }
  func.func @transform_1(%arg0: i32, %arg1: i32) -> (i32, i32, i32) {
    %c0_i32 = arith.constant 0 : i32
    %c0_i32_0 = arith.constant 0 : i32
    %c0_i32_1 = arith.constant 0 : i32
    return %arg1, %c0_i32, %c0_i32_0 : i32, i32, i32
  }
  func.func @transform_2(%arg0: i32, %arg1: i32) -> (i32, i32, i32) {
    %c0_i32 = arith.constant 0 : i32
    %c0_i32_0 = arith.constant 0 : i32
    %c0_i32_1 = arith.constant 0 : i32
    return %arg1, %c0_i32, %c0_i32_0 : i32, i32, i32
  }
  func.func @transform_3(%arg0: i32, %arg1: i32) -> (i32, i32, i32) {
    %c0_i32 = arith.constant 0 : i32
    %c0_i32_0 = arith.constant 0 : i32
    %c0_i32_1 = arith.constant 0 : i32
    return %arg1, %c0_i32, %c0_i32_0 : i32, i32, i32
  }
  func.func @transform_4(%arg0: i32, %arg1: i32) -> (i32, i32, i32) {
    %c0_i32 = arith.constant 0 : i32
    %c0_i32_0 = arith.constant 0 : i32
    %c0_i32_1 = arith.constant 0 : i32
    return %arg1, %c0_i32, %c0_i32_0 : i32, i32, i32
  }
  func.func @transform_5(%arg0: i32, %arg1: i32) -> (i32, i32, i32) {
    %c0_i32 = arith.constant 0 : i32
    %c0_i32_0 = arith.constant 0 : i32
    %c0_i32_1 = arith.constant 0 : i32
    return %arg1, %c0_i32, %c0_i32_0 : i32, i32, i32
  }
  func.func @transform_6(%arg0: i32, %arg1: i32) -> (i32, i32, i32) {
    %c0_i32 = arith.constant 0 : i32
    %c0_i32_0 = arith.constant 0 : i32
    %c0_i32_1 = arith.constant 0 : i32
    return %arg1, %c0_i32, %c0_i32_0 : i32, i32, i32
  }
  func.func @transform_7(%arg0: i32, %arg1: i32) -> (i32, i32, i32) {
    %c0_i32 = arith.constant 0 : i32
    %c0_i32_0 = arith.constant 0 : i32
    %c0_i32_1 = arith.constant 0 : i32
    return %arg1, %c0_i32, %c0_i32_0 : i32, i32, i32
  }
  func.func @transform_8(%arg0: i32, %arg1: i32) -> (i32, i32, i32) {
    %c0_i32 = arith.constant 0 : i32
    %c0_i32_0 = arith.constant 0 : i32
    %c0_i32_1 = arith.constant 0 : i32
    return %arg1, %c0_i32, %c0_i32_0 : i32, i32, i32
  }
  func.func @transform_9(%arg0: i32, %arg1: i32) -> (i32, i32, i32) {
    %c0_i32 = arith.constant 0 : i32
    %c0_i32_0 = arith.constant 0 : i32
    %c0_i32_1 = arith.constant 0 : i32
    return %arg1, %c0_i32, %c0_i32_0 : i32, i32, i32
  }
  func.func @transform_10(%arg0: i32, %arg1: i32) -> (i32, i32, i32) {
    %c0_i32 = arith.constant 0 : i32
    %c0_i32_0 = arith.constant 0 : i32
    %c0_i32_1 = arith.constant 0 : i32
    return %arg1, %c0_i32, %c0_i32_0 : i32, i32, i32
  }
  func.func @transform_11(%arg0: i32, %arg1: i32) -> (i32, i32, i32) {
    %c0_i32 = arith.constant 0 : i32
    %c0_i32_0 = arith.constant 0 : i32
    %c0_i32_1 = arith.constant 0 : i32
    return %arg1, %c0_i32, %c0_i32_0 : i32, i32, i32
  }
  func.func @transform_12(%arg0: i32, %arg1: i32) -> (i32, i32, i32) {
    %c0_i32 = arith.constant 0 : i32
    %c0_i32_0 = arith.constant 0 : i32
    %c0_i32_1 = arith.constant 0 : i32
    return %arg1, %c0_i32, %c0_i32_0 : i32, i32, i32
  }
  func.func @transform_13(%arg0: i32, %arg1: i32) -> (i32, i32, i32) {
    %c0_i32 = arith.constant 0 : i32
    %c0_i32_0 = arith.constant 0 : i32
    %c0_i32_1 = arith.constant 0 : i32
    return %arg1, %c0_i32, %c0_i32_0 : i32, i32, i32
  }
  func.func @transform_14(%arg0: i32, %arg1: i32) -> (i32, i32) {
    %c0_i32 = arith.constant 0 : i32
    %c0_i32_0 = arith.constant 0 : i32
    %c0_i32_1 = arith.constant 0 : i32
    return %c0_i32, %c0_i32_0 : i32, i32
  }
  func.func @transform_15(%arg0: i32, %arg1: i32) -> (i32, i32) {
    %c0_i32 = arith.constant 0 : i32
    %c0_i32_0 = arith.constant 0 : i32
    %c0_i32_1 = arith.constant 0 : i32
    return %c0_i32, %c0_i32_0 : i32, i32
  }
  func.func @transform_16(%arg0: i32, %arg1: i32) -> (i32, i32, i32) {
    %c0_i32 = arith.constant 0 : i32
    %c0_i32_0 = arith.constant 0 : i32
    %c0_i32_1 = arith.constant 0 : i32
    return %arg0, %c0_i32, %c0_i32_0 : i32, i32, i32
  }
}

</mosaic_0001>

<bundles_post_ra>
// kernel: tpu_custom_call.1
= control target key start
LH: loop header
LB: loop body
LE: loop exit
PB: predicated region body
PF: predicated region fallthrough
CT: control target
= control target key end

     0   :  { %s3506_s0 = inlined_call_operand.vmem [shape: f32[2,8,32], index: 0, kind: input, shape index: {}]   ;;  %s3507_s1 = inlined_call_operand.vmem [shape: f32[2,1,32], index: 1, kind: input, shape index: {}]   ;;  %s3508_s2 = inlined_call_operand.vmem [shape: f32[2,1,32], index: 2, kind: input, shape index: {}]   ;;  %s3509_s3 = inlined_call_operand.vmem [shape: bf16[2,32,64], index: 3, kind: input, shape index: {}]   ;;  %s3510_s4 = inlined_call_operand.vmem [shape: bf16[2,32,64], index: 4, kind: input, shape index: {}]   ;;  %s3511_s5 = inlined_call_operand.vmem [shape: bf16[2,32,64], index: 5, kind: input, shape index: {}]   ;;  %s3512_s6 = inlined_call_operand.vmem [shape: bf16[2,64,32], index: 6, kind: input, shape index: {}]   ;;  %s3513_s7 = inlined_call_operand.vmem [shape: f32[2,1,32], index: 7, kind: input, shape index: {}]   ;;  %s3514_s8 = inlined_call_operand.vmem [shape: f32[2,1,32], index: 8, kind: input, shape index: {}]   ;;  %s3515_s9 = inlined_call_operand.vmem [shape: f32[2,1,32], index: 9, kind: input, shape index: {}]   ;;  %s3516_s10 = inlined_call_operand.vmem [shape: bf16[2,32,64], index: 10, kind: input, shape index: {}]   ;;  %s3517_s11 = inlined_call_operand.vmem [shape: f32[2,1,64], index: 11, kind: input, shape index: {}]   ;;  %s3518_s12 = inlined_call_operand.vmem [shape: bf16[2,64,32], index: 12, kind: input, shape index: {}]   ;;  %s3519_s13 = inlined_call_operand.vmem [shape: f32[2,1,32], index: 13, kind: input, shape index: {}]   ;;  %s3520_s14 = inlined_call_operand.vmem [shape: f32[1,32], index: 14, kind: input, shape index: {}]   ;;  %s3521_s15 = inlined_call_operand.vmem [shape: f32[1,32], index: 15, kind: input, shape index: {}]   ;;  %s3522_s16 = inlined_call_operand.hbm [shape: f32[2,8,32], index: 16, kind: output, shape index: {}]  }
   0x1   :  { %3539 = sst [smem:[#allocation20_spill]] %s3506_s0 }
   0x2   :  { %3540 = sst [smem:[#allocation21_spill]] %s3508_s2 }
   0x3   :  { %3541 = sst [smem:[#allocation22_spill]] %s3509_s3 }
   0x4   :  { %3542 = sst [smem:[#allocation23_spill]] %s3510_s4 }
   0x5   :  { %3543 = sst [smem:[#allocation24_spill]] %s3511_s5 }
   0x6   :  { %3544 = sst [smem:[#allocation25_spill]] %s3512_s6 }
   0x7   :  { %3545 = sst [smem:[#allocation26_spill]] %s3519_s13 }
   0x8   :  { %3546 = sst [smem:[#allocation27_spill]] %s3520_s14 }
   0x9   :  { %3547 = sst [smem:[#allocation28_spill]] %s3521_s15 }
   0xa   :  { %3548 = sst [smem:[#allocation29_spill]] %s3522_s16 }
   0xb   :  { %21 = vsyncpa [#allocation4], 0 }
   0xc   :  { %23 = vsyncpa [#allocation4 + $0x1], 0  ;;  %s3060_s21 = smov 0   ;;  %s3062_s22 = smov 0  }
   0xd   :  { %s3064_s23 = smov 0   ;;  %s3066_s24 = smov 0  }
   0xe   :  { %s3068_s25 = smov 0   ;;  %s3070_s26 = smov 0  }
   0xf   :  { %s3072_s27 = smov 0   ;;  %s3074_s28 = smov 0  }
  0x10 LB: > { %3549 = sst [smem:[#allocation6_spill]] %s2934_s21  ;;  %s2525_s29 = sadd.s32 4294967295, %s2962_s28   ;;  %s2962_s28 = sphi %s3074_s28, %s29_s28   ;;  %s2958_s27 = sphi %s3072_s27, %s3598_s27   ;;  %s2954_s26 = sphi %s3070_s26, %s3597_s26   ;;  %s2950_s25 = sphi %s3068_s25, %s3596_s25   ;;  %s2946_s24 = sphi %s3066_s24, %s3595_s24   ;;  %s2942_s23 = sphi %s3064_s23, %s3594_s23   ;;  %s2938_s22 = sphi %s3062_s22, %s3593_s22   ;;  %s2934_s21 = sphi %s3060_s21, %s3592_s21  }
  0x11   : > { %3550 = sst [smem:[#allocation7_spill]] %s2938_s22  ;;  %s2526_s30 = sadd.s32 4294967294, %s2962_s28  }
  0x12   : > { %3551 = sst [smem:[#allocation8_spill]] %s2942_s23  ;;  %s38_s0 = sadd.s32 1, %s2954_s26 }
  0x13   : > { %3552 = sst [smem:[#allocation9_spill]] %s2946_s24  ;;  %p39_p0 = scmp.ge.s32.totalorder %s38_s0, 2 }
  0x14   : > { %3553 = sst [smem:[#allocation10_spill]] %s2950_s25  ;;  %s41_s17 = sadd.s32 1, %s2958_s27 }
  0x15   : > { %3554 = sst [smem:[#allocation11_spill]] %s2954_s26  ;;  %p464_p1 = scmp.ne.s32.totalorder %s2942_s23, %s2938_s22 }
  0x16   : > { %3555 = sst [smem:[#allocation12_spill]] %s2958_s27  ;;  %p465_p2 = scmp.eq.s32.totalorder %s2525_s29, 3 }
  0x17   : > { %3556 = sst [smem:[#allocation13_spill]] %s2962_s28  ;;  %s3600_s0 = smov (%p39_p0, %s38_s0), 0 }
  0x18   : > { %3557 = sst [smem:[#allocation14_spill]] %s3600_s0  ;;  %s3602_s17 = smov (!%p39_p0, %s41_s17), %s2958_s27 }
  0x19   : > { %p3109_p3 = por %p465_p2, %p464_p1  ;;  %p470_p4 = scmp.ne.s32.totalorder %s2938_s22, %s2934_s21 }
  0x1a   : > { %p43_p5 = scmp.ge.s32.totalorder %s3602_s17, 2  ;;  %p471_p6 = scmp.eq.s32.totalorder %s2526_s30, 3 }
  0x1b   : > { %s3558_s18 = scalar_select %p3109_p3, 1, 0 }
  0x1c   : > { %p2529_p7 = scmp.ge.s32.totalorder %s2962_s28, 1  ;;  %p592_p8 = scmp.lt.s32.totalorder %s2962_s28, 5 }
  0x1d   : > { %3559 = sst [smem:[#allocation15_spill]] %s3558_s18  ;;  %s3604_s17 = smov (%p43_p5, %s3602_s17), 0 }
  0x1e   : > { %3560 = sst [smem:[#allocation16_spill]] %s3604_s17  ;;  %p3119_p9 = por %p471_p6, %p470_p4 }
  0x1f   : > { %p593_p10 = pnand %p2529_p7, %p592_p8  ;;  %s451_s20 = ssub.s32 %s2958_s27, %s3604_s17 }
  0x20   : > { %s3561_s19 = scalar_select %p3119_p9, 1, 0 }
  0x21   : > { %s454_s29 = sadd.s32 1, %s2942_s23  ;;  %p452_p11 = scmp.eq.s32.totalorder %s451_s20, 0 }
  0x22   : > { %3562 = sst [smem:[#allocation17_spill]] %s3561_s19  ;;  %596 = sbr.rel (%p593_p10) target bundleno = 2881 (0xb41), region = 84 }
  0x23   : > { %s3127_s0 = scalar_select %p452_p11, %s2942_s23, %s454_s29  }
  0x25   : > { %3563 = sst [smem:[#allocation18_spill]] %s3127_s0 }
  0x29   : > { %s3528_s30 = sand.u32 1, %s2938_s22   ;;  %p692_p12 = scmp.lt.s32.totalorder %s2950_s25, 1 }
  0x2a   : > { %s3133_s26 = sshll.u32 %s3528_s30, 3  ;;  %p696_p13 = scmp.lt.s32.totalorder %s2946_s24, 1 }
  0x2b   : > { %s693_s19 = scalar_select %p692_p12, %s2950_s25, 1 }
  0x2c   : > { %s3138_s21 = scalar_select %p696_p13, %s2946_s24, 1 }
  0x2d   : > { %s2531_s20 = sshll.u32 %s693_s19, 3  ;;  %s3564_s27 = sld [smem:[#allocation20_spill]] }
  0x2e   : > { %s2597_s25 = sshll.u32 %s3138_s21, 4  ;;  %s3566_s3 = sld [smem:[#allocation22_spill]] }
  0x2f   : > { %s3567_s4 = sld [smem:[#allocation23_spill]]  ;;  %s3568_s5 = sld [smem:[#allocation24_spill]] }
  0x30   : > { %s2600_s30 = sshll.u32 %s3138_s21, 5  ;;  %s3569_s6 = sld [smem:[#allocation25_spill]] }
  0x31   : > { %s3188_s2 = scalar_lea.vmem %s3516_s10, %s2597_s25  ;;  %s3197_s14 = scalar_lea.vmem %s3518_s12, %s2600_s30 }
  0x32   : > { %s3571_s13 = sld [smem:[#allocation26_spill]]  ;;  %s3572_s19 = sld [smem:[#allocation9_spill]] }
  0x33   : > { %s695_s0 = scalar_lea.vmem %s3564_s27, %s2531_s20  ;;  %s730_s27 = scalar_lea.vmem %s3515_s9, %s3138_s21 }
  0x34   : > { %s3155_s24 = scalar_lea.vmem %s3566_s3, %s2597_s25 }
  0x35   : > { %s3160_s17 = scalar_lea.vmem %s3567_s4, %s2597_s25  ;;  %s3165_s23 = scalar_lea.vmem %s3568_s5, %s2597_s25 }
  0x36   : > { %s3171_s18 = scalar_lea.vmem %s3569_s6, %s2600_s30  ;;  %s738_s6 = scalar_lea.vmem %s3517_s11, %s3138_s21 }
  0x37   : > { %3570 = sst [smem:[#allocation19_spill]] %s3171_s18  ;;  %s691_s4 = scalar_lea.vmem [#allocation3], %s3133_s26 }
  0x38   : > { %s746_s15 = scalar_lea.vmem %s3571_s13, %s3138_s21  ;;  %p2544_p0 = scmp.ne.s32.totalorder %s3572_s19, 0 }
  0x39   : > { %v752_v0 = vld [vmem:[%s695_s0] sm:$0xff] (!%p2544_p0)  ;;  %vm753_vm0 = vcmask (!%p2544_p0), 261120  }
  0x3a   : > { %751 = sbr.rel (%p2544_p0) target bundleno = 65 (0x41), region = 88  ;;  %754 = vst.msk [vmem:[#allocation2] sm:$0xff] (!%p2544_p0), %vm753_vm0, %v752_v0 }
  0x41 PF: > { %v755_v1 = vld [vmem:[#allocation2] sm:$0xff]  ;;  %vm758_vm1 = vcmask 261120   ;;  %v2964_v10 = vmov 0.0   ;;  %v2828_v11 = vld [vmem:[%s3155_s24 + $0x8] sm:$0xff]   ;;  %vm2965_vm2 = vmmov 0   ;;  %s3573_s25 = scalar_lea.vmem %s3507_s1, %s3138_s21  ;;  %s3574_s30 = sld [smem:[#allocation21_spill]]  ;;  %v975_v40 = vlaneseq }
  0x42   : > { %v759_v2 = vsel %vm758_vm1, %v755_v1, 0.0  ;;  %v2826_v8 = vld [vmem:[%s3155_s24] sm:$0xff]   ;;  %2641 = vmatprep.subr.bf16.mxu1 %v2964_v10  ;;  %2657 = vmatprep.subr.bf16.mxu0 %v2964_v10  ;;  %v2829_v12 = vld [vmem:[%s3165_s23 + $0x8] sm:$0xff]   ;;  %s2967_s13 = smov 112   ;;  %s2968_s20 = smov 96   ;;  %vm1410_vm3 = vcmask 130048  }
  0x43   : > { %760 = vadd.xlane.f32.xlu0 %v759_v2  ;;  %v2827_v9 = vld [vmem:[%s3165_s23] sm:$0xff]   ;;  %2642 = vmatpush3.bf16.msra.mxu1 %v2826_v8  ;;  %v2831_v24 = vld [vmem:[%s3160_s17 + $0x8] sm:$0xff]   ;;  %v2969_v38 = vmov 1983009808   ;;  %v2970_v41 = vmov 1934713408   ;;  %s3577_s5 = scalar_lea.vmem %s3513_s7, %s3138_s21  ;;  %s3578_s0 = scalar_lea.vmem %s3514_s8, %s3138_s21 }
  0x44   : > { %2658 = vmatpush3.bf16.msra.mxu0 %v2827_v9  ;;  %2643 = vmatprep.subr.bf16.mxu1 %v2964_v10  ;;  %v2545_v17 = vld [vmem:[%s3573_s25] ss:$0 sm:$0xff]  ;;  %v973_v39 = vunpack.c.l.s4 %v2969_v38  ;;  %v1005_v42 = vunpack.c.l.s4 %v2970_v41  ;;  %v976_v44 = vshrl.u32 %v975_v40, 7  ;;  %vm1595_vm4 = vcmask 64512   ;;  %s3576_s29 = sld [smem:[#allocation19_spill]]  ;;  %s2971_s16 = smov 32  }
  0x45   : > { %2659 = vmatprep.subr.bf16.mxu0 %v2964_v10  ;;  %2645 = vmatprep.mubr.msk.bf16.mxu1 %vm2965_vm2, %v2964_v10  ;;  %v2830_v22 = vld [vmem:[%s3160_s17] sm:$0xff]   ;;  %s2966_s17 = smov 80   ;;  %vm1643_vm5 = vcmask 1043456   ;;  %s2972_s22 = smov 16   ;;  %vm1979_vm6 = vcmask 392192   ;;  %vm2021_vm7 = vcmask 523264  }
  0x46   : > { %2661 = vmatprep.mubr.msk.bf16.mxu0 %vm2965_vm2, %v2964_v10  ;;  %v974_v43 = vunpack.c.0.s8 %v973_v39  ;;  %v1006_v47 = vunpack.c.0.s8 %v1005_v42  ;;  %s2973_s3 = smov 48  }
  0x47   : > { %2644 = vmatpush3.bf16.msra.mxu1 %v2828_v11  ;;  %s3575_s18 = scalar_lea.vmem %s3574_s30, %s3138_s21 }
  0x48   : > { %2660 = vmatpush3.bf16.msra.mxu0 %v2829_v12  ;;  %2649 = vmatprep.subr.bf16.mxu1 %v2964_v10  ;;  %v2546_v19 = vld [vmem:[%s3575_s18] ss:$0 sm:$0xff]  ;;  %v3251_v48 = vsub.s32 %v974_v43, %v976_v44  ;;  %v3253_v54 = vsub.s32 %v1006_v47, %v976_v44 }
  0x49   : > { %2671 = vmatprep.subr.bf16.mxu0 %v2964_v10 }
  0xd0   : > { %v761_v3 = vpop.xlane.xlu0 %760 }
  0xd1   : > { %v763_v4 = vmul.f32 0.03125, %v761_v3 }
  0xd3   : > { %v764_v5 = vsub.f32 %v755_v1, %v763_v4 }
  0xd5   : > { %v765_v6 = vmul.f32 %v764_v5, %v764_v5 }
  0xd7   : > { %v766_v7 = vsel %vm758_vm1, %v765_v6, 0.0 }
  0xd8   : > { %767 = vadd.xlane.f32.xlu0 %v766_v7 }
 0x165   : > { %v768_v13 = vpop.xlane.xlu0 %767 }
 0x166   : > { %v769_v14 = vmul.f32 0.03125, %v768_v13 }
 0x168   : > { %v770_v15 = vadd.f32 1e-05, %v769_v14 }
 0x16a   : > { %2842 = vrsqrt.f32 %v770_v15 }
 0x174   : > { %v2843_v16 = vpop.eup %2842 }
 0x175   : > { %v772_v18 = vmul.f32 %v2843_v16, %v764_v5 }
 0x177   : > { %v779_v20 = vmul.f32 %v2545_v17, %v772_v18 }
 0x179   : > { %v786_v21 = vadd.f32 %v2546_v19, %v779_v20 }
 0x17b   : > { %v791_v23 = vpack.c.bf16 %v786_v21, %v786_v21 }
 0x17d   : > { %2646 = vmatmul.mubr.msk.bf16.vlgmr.msra.gmra.mrb[0].mxu1 %vm758_vm1, %v791_v23  ;;  %2662 = vmatmul.mubr.msk.bf16.vlgmr.msra.gmra.mrb[0].mxu0 %vm758_vm1, %v791_v23 }
 0x17e   : > { %2650 = vmatpush3.bf16.msra.mxu1 %v2830_v22  ;;  %2653 = vmatprep.mubr.msk.bf16.mxu1 %vm2965_vm2, %v2964_v10 }
 0x17f   : > { %2651 = vmatprep.subr.bf16.mxu1 %v2964_v10  ;;  %2673 = vmatprep.mubr.msk.bf16.mxu0 %vm2965_vm2, %v2964_v10 }
 0x182   : > { %2652 = vmatpush3.bf16.msra.mxu1 %v2831_v24 }
 0x183   : > { %2665 = vmatprep.subr.bf16.mxu1 %v2964_v10 }
 0x185   : > { %2654 = vmatmul.mubr.msk.bf16.vlgmr.msra.gmra.mrb[4].mxu1 %vm758_vm1, %v791_v23 }
 0x186   : > { %2667 = vmatprep.mubr.msk.bf16.mxu1 %vm2965_vm2, %v2964_v10 }
 0x250   : > { %v841_v25 = vpop.f32.mrb[0].mxu1  ;;  %v3244_v26 = vpop.f32.mrb[0].mxu0 }
 0x251   : > { %v2647_v27 = vpop.f32.mrb[1].mxu1  ;;  %v2663_v28 = vpop.f32.mrb[1].mxu0  ;;  %v847_v37 = vmul.f32 0.25, %v841_v25 }
 0x252   : > { %v844_v29 = vpop.f32.mrb[2].mxu1  ;;  %v957_v30 = vpop.f32.mrb[2].mxu0 }
 0x253   : > { %v2648_v31 = vpop.f32.mrb[3].mxu1  ;;  %v2664_v32 = vpop.f32.mrb[3].mxu0 }
 0x258   : > { %v898_v33 = vpop.f32.mrb[4].mxu1 }
 0x259   : > { %1117 = vrot.lane.b32.xlu0 %v898_v33, %s2966_s17  ;;  %1111 = vrot.lane.b32.xlu1 %v898_v33, %s2967_s13  ;;  %v2655_v34 = vpop.f32.mrb[5].mxu1 }
 0x25a   : > { %v901_v35 = vpop.f32.mrb[6].mxu1 }
 0x25b   : > { %v2656_v36 = vpop.f32.mrb[7].mxu1 }
 0x25d   : > { %1114 = vrot.lane.b32.xlu1 %v898_v33, %s2968_s20 }
 0x261   : > { %961 = vrot.lane.b32.xlu1 %v847_v37, %s2967_s13 }
 0x265   : > { %964 = vrot.lane.b32.xlu1 %v847_v37, %s2968_s20 }
 0x269   : > { %967 = vrot.lane.b32.xlu1 %v847_v37, %s2966_s17 }
 0x26d   : > { %1261 = vrot.lane.b32.xlu1 %v3244_v26, %s2967_s13 }
 0x2cb   : > { %v1118_v45 = vpop.permute.xlu0 %1117  ;;  %v1112_v46 = vpop.permute.xlu1 %1111 }
 0x2cc   : > { %v1136_v49 = vcombine.low %v1112_v46, %v1118_v45  ;;  %v1137_v50 = vcombine.high %v1112_v46, %v1118_v45 }
 0x2ce   : > { %v1144_v55 = vrot.slane %v1136_v49, %v3251_v48  ;;  %v1151_v56 = vrot.slane %v1137_v50, %v3251_v48 }
 0x2cf   : > { %v1115_v51 = vpop.permute.xlu1 %1114 }
 0x2d0   : > { %v1120_v52 = vcombine.low %v898_v33, %v1115_v51  ;;  %v1121_v53 = vcombine.high %v898_v33, %v1115_v51 }
 0x2d2   : > { %v1128_v57 = vrot.slane %v1120_v52, %v3251_v48  ;;  %v1135_v58 = vrot.slane %v1121_v53, %v3251_v48 }
 0x2d3   : > { %v962_v59 = vpop.permute.xlu1 %961 }
 0x2d4   : > { %v1152_v60 = vcombine.low %v1128_v57, %v1144_v55  ;;  %v1153_v61 = vcombine.high %v1128_v57, %v1144_v55  ;;  %v1168_v62 = vcombine.low %v1135_v58, %v1151_v56  ;;  %v1169_v63 = vcombine.high %v1135_v58, %v1151_v56 }
 0x2d6   : > { %v1160_v0 = vrot.slane %v1152_v60, %v3253_v54  ;;  %v1167_v1 = vrot.slane %v1153_v61, %v3253_v54  ;;  %v1176_v2 = vrot.slane %v1168_v62, %v3253_v54  ;;  %v1183_v3 = vrot.slane %v1169_v63, %v3253_v54 }
 0x2d7   : > { %v965_v4 = vpop.permute.xlu1 %964 }
 0x2d8   : > { %v1188_v5 = vcombine.low %v1160_v0, %v1167_v1  ;;  %v2558_v6 = vcombine.high %v1160_v0, %v1167_v1  ;;  %v1204_v7 = vcombine.low %v1176_v2, %v1183_v3  ;;  %v2559_v8 = vcombine.high %v1176_v2, %v1183_v3 }
 0x2d9   : > { %v970_v9 = vcombine.low %v847_v37, %v965_v4  ;;  %v971_v11 = vcombine.high %v847_v37, %v965_v4 }
 0x2da   : > { %v1195_v12 = vrot.slane %v1188_v5, %v3251_v48  ;;  %v1203_v13 = vrot.slane %v2558_v6, %v3251_v48  ;;  %v1211_v14 = vrot.slane %v1204_v7, %v3251_v48  ;;  %v1219_v15 = vrot.slane %v2559_v8, %v3251_v48 }
 0x2db   : > { %v968_v16 = vpop.permute.xlu1 %967  ;;  %v978_v21 = vrot.slane %v970_v9, %v3251_v48  ;;  %v985_v22 = vrot.slane %v971_v11, %v3251_v48 }
 0x2dc   : > { %v986_v17 = vcombine.low %v962_v59, %v968_v16  ;;  %v987_v18 = vcombine.high %v962_v59, %v968_v16  ;;  %v1220_v19 = vcombine.low %v1195_v12, %v1203_v13  ;;  %v1236_v20 = vcombine.low %v1211_v14, %v1219_v15 }
 0x2dd   : > { %v1221_v28 = vcombine.high %v1195_v12, %v1203_v13  ;;  %v1237_v29 = vcombine.high %v1211_v14, %v1219_v15 }
 0x2de   : > { %v994_v23 = vrot.slane %v986_v17, %v3251_v48  ;;  %v1001_v24 = vrot.slane %v987_v18, %v3251_v48  ;;  %v1228_v25 = vrot.slane %v1220_v19, %v3253_v54  ;;  %v1244_v27 = vrot.slane %v1236_v20, %v3253_v54 }
 0x2df   : > { %v1235_v42 = vrot.slane %v1221_v28, %v3253_v54  ;;  %v1251_v43 = vrot.slane %v1237_v29, %v3253_v54 }
 0x2e0   : > { %v1002_v30 = vcombine.low %v978_v21, %v994_v23  ;;  %v1003_v31 = vcombine.high %v978_v21, %v994_v23  ;;  %v1018_v32 = vcombine.low %v985_v22, %v1001_v24  ;;  %v1019_v33 = vcombine.high %v985_v22, %v1001_v24 }
 0x2e1   : > { %v1252_v34 = vcombine.low %v1228_v25, %v1244_v27  ;;  %v1253_v35 = vcombine.high %v1228_v25, %v1244_v27  ;;  %v1254_v58 = vcombine.low %v1235_v42, %v1251_v43  ;;  %v1255_v59 = vcombine.high %v1235_v42, %v1251_v43 }
 0x2e2   : > { %v1010_v36 = vrot.slane %v1002_v30, %v3253_v54  ;;  %v1017_v37 = vrot.slane %v1003_v31, %v3253_v54  ;;  %v1026_v38 = vrot.slane %v1018_v32, %v3253_v54  ;;  %v1033_v39 = vrot.slane %v1019_v33, %v3253_v54 }
 0x2e3   : > { %v1256_v40 = vpack.c.bf16 %v1252_v34, %v1252_v34  ;;  %v1257_v41 = vpack.c.bf16 %v1253_v35, %v1253_v35  ;;  %v1258_v2 = vpack.c.bf16 %v1254_v58, %v1254_v58  ;;  %v1259_v3 = vpack.c.bf16 %v1255_v59, %v1255_v59 }
 0x2e4   : > { %v1038_v44 = vcombine.low %v1010_v36, %v1017_v37  ;;  %v2556_v45 = vcombine.high %v1010_v36, %v1017_v37  ;;  %v1054_v46 = vcombine.low %v1026_v38, %v1033_v39  ;;  %v2557_v47 = vcombine.high %v1026_v38, %v1033_v39  ;;  %v1262_v36 = vpop.permute.xlu1 %1261 }
 0x2e5   : > { %v1415_v49 = vsel %vm1410_vm3, %v1256_v40, 0  ;;  %v1461_v50 = vsel %vm1410_vm3, %v1257_v41, 0  ;;  %v1507_v8 = vsel %vm1410_vm3, %v1258_v2, 0  ;;  %v1553_v9 = vsel %vm1410_vm3, %v1259_v3, 0 }
 0x2e6   : > { %v1045_v51 = vrot.slane %v1038_v44, %v3251_v48  ;;  %v1053_v52 = vrot.slane %v2556_v45, %v3251_v48  ;;  %v1061_v53 = vrot.slane %v1054_v46, %v3251_v48  ;;  %v1069_v55 = vrot.slane %v2557_v47, %v3251_v48  ;;  %2666 = vmatpush3.bf16.xpose.msra.mxu1 %v1415_v49 }
 0x2e7   : > { %2672 = vmatpush3.bf16.xpose.msra.mxu0 %v1461_v50  ;;  %2677 = vmatprep.subr.bf16.mxu1 %v2964_v10 }
 0x2e8   : > { %v1070_v56 = vcombine.low %v1045_v51, %v1053_v52  ;;  %v1086_v57 = vcombine.low %v1061_v53, %v1069_v55  ;;  %2683 = vmatprep.subr.bf16.mxu0 %v2964_v10  ;;  %v1071_v60 = vcombine.high %v1045_v51, %v1053_v52  ;;  %v1087_v61 = vcombine.high %v1061_v53, %v1069_v55 }
 0x2ea   : > { %v1078_v62 = vrot.slane %v1070_v56, %v3253_v54  ;;  %v1094_v63 = vrot.slane %v1086_v57, %v3253_v54  ;;  %v1085_v6 = vrot.slane %v1071_v60, %v3253_v54  ;;  %v1101_v7 = vrot.slane %v1087_v61, %v3253_v54 }
 0x2ec   : > { %v1102_v0 = vcombine.low %v1078_v62, %v1094_v63  ;;  %v1103_v1 = vcombine.high %v1078_v62, %v1094_v63  ;;  %v1104_v11 = vcombine.low %v1085_v6, %v1101_v7  ;;  %v1105_v12 = vcombine.high %v1085_v6, %v1101_v7 }
 0x2ee   : > { %v1106_v4 = vpack.c.bf16 %v1102_v0, %v1102_v0  ;;  %v1107_v5 = vpack.c.bf16 %v1103_v1, %v1103_v1  ;;  %v1108_v13 = vpack.c.bf16 %v1104_v11, %v1104_v11  ;;  %v1109_v14 = vpack.c.bf16 %v1105_v12, %v1105_v12 }
 0x2f0   : > { %2668 = vmatmul.mubr.msk.bf16.vlgmr.msra.gmra.mrb[8].mxu1 %vm1410_vm3, %v1106_v4  ;;  %2674 = vmatmul.mubr.msk.bf16.vlgmr.msra.gmra.mrb[4].mxu0 %vm1410_vm3, %v1107_v5 }
 0x2f1   : > { %2678 = vmatpush3.bf16.xpose.msra.mxu1 %v1507_v8  ;;  %2684 = vmatpush3.bf16.xpose.msra.mxu0 %v1553_v9 }
 0x2f2   : > { %2679 = vmatprep.mubr.msk.bf16.mxu1 %vm2965_vm2, %v2964_v10  ;;  %2685 = vmatprep.mubr.msk.bf16.mxu0 %vm2965_vm2, %v2964_v10 }
 0x2f3   : > { %2689 = vmatprep.subr.bf16.mxu1 %v2964_v10  ;;  %2695 = vmatprep.subr.bf16.mxu0 %v2964_v10 }
 0x2f8   : > { %2680 = vmatmul.mubr.msk.bf16.vlgmr.msra.gmra.mrb[12].mxu1 %vm1410_vm3, %v1108_v13  ;;  %2686 = vmatmul.mubr.msk.bf16.vlgmr.msra.gmra.mrb[8].mxu0 %vm1410_vm3, %v1109_v14 }
 0x2f9   : > { %2691 = vmatprep.mubr.msk.bf16.mxu1 %vm2965_vm2, %v2964_v10  ;;  %2697 = vmatprep.mubr.msk.bf16.mxu0 %vm2965_vm2, %v2964_v10 }
 0x3c3   : > { %v1451_v15 = vpop.f32.mrb[8].mxu1  ;;  %v1497_v16 = vpop.f32.mrb[4].mxu0 }
 0x3c4   : > { %v2669_v17 = vpop.f32.mrb[9].mxu1  ;;  %v2675_v18 = vpop.f32.mrb[5].mxu0  ;;  %v1599_v19 = vsel %vm1595_vm4, %v1497_v16, -inf  ;;  %v1596_v20 = vsel %vm1595_vm4, %v1451_v15, -inf }
 0x3c5   : > { %1600 = vmax.xlane.f32.xlu0 %v1599_v19  ;;  %v1500_v21 = vpop.f32.mrb[6].mxu0  ;;  %1597 = vmax.xlane.f32.xlu1 %v1596_v20  ;;  %v1454_v22 = vpop.f32.mrb[10].mxu1 }
 0x3c6   : > { %v2670_v23 = vpop.f32.mrb[11].mxu1  ;;  %v2676_v24 = vpop.f32.mrb[7].mxu0 }
 0x3cb   : > { %v3309_v25 = vpop.f32.mrb[12].mxu1  ;;  %v3311_v27 = vpop.f32.mrb[8].mxu0 }
 0x3cc   : > { %v2681_v28 = vpop.f32.mrb[13].mxu1  ;;  %v2687_v29 = vpop.f32.mrb[9].mxu0  ;;  %v1605_v34 = vsel %vm1595_vm4, %v3311_v27, -inf  ;;  %v1602_v35 = vsel %vm1595_vm4, %v3309_v25, -inf }
 0x3cd   : > { %v1546_v30 = vpop.f32.mrb[14].mxu1  ;;  %v1592_v31 = vpop.f32.mrb[10].mxu0 }
 0x3ce   : > { %v2682_v32 = vpop.f32.mrb[15].mxu1  ;;  %v2688_v33 = vpop.f32.mrb[11].mxu0 }
 0x3d6   : > { %1267 = vrot.lane.b32.xlu1 %v3244_v26, %s2966_s17  ;;  %s3580_s17 = sld [smem:[#allocation9_spill]] }
 0x3db   : > { %1264 = vrot.lane.b32.xlu0 %v3244_v26, %s2968_s20 }
 0x3dc   : > { %p2590_p1 = scmp.ne.s32.totalorder %s3580_s17, 1 }
 0x3dd   : > { %s3581_s13 = sld [smem:[#allocation27_spill]] (!%p2590_p1) }
 0x3fa   : > { %1606 = vmax.xlane.f32.xlu0 %v1605_v34  ;;  %1603 = vmax.xlane.f32.xlu1 %v1602_v35 }
 0x452   : > { %v1601_v37 = vpop.xlane.xlu0 %1600  ;;  %v1598_v38 = vpop.xlane.xlu1 %1597 }
 0x453   : > { %v1609_v39 = vsub.f32 %v1497_v16, %v1601_v37  ;;  %v1608_v40 = vsub.f32 %v1451_v15, %v1598_v38 }
 0x455   : > { %v1614_v41 = vmul.f32 1.442695, %v1609_v39  ;;  %v1612_v42 = vmul.f32 1.442695, %v1608_v40 }
 0x456   : > { %v1265_v43 = vpop.permute.xlu0 %1264  ;;  %v1268_v44 = vpop.permute.xlu1 %1267 }
 0x457   : > { %2844 = vpow2.f32 %v1614_v41  ;;  %v1270_v45 = vcombine.low %v3244_v26, %v1265_v43  ;;  %v1271_v46 = vcombine.high %v3244_v26, %v1265_v43  ;;  %v1286_v47 = vcombine.low %v1262_v36, %v1268_v44 }
 0x458   : > { %2846 = vpow2.f32 %v1612_v42  ;;  %v1287_v49 = vcombine.high %v1262_v36, %v1268_v44 }
 0x459   : > { %v1278_v50 = vrot.slane %v1270_v45, %v3251_v48  ;;  %v1285_v51 = vrot.slane %v1271_v46, %v3251_v48  ;;  %v1294_v52 = vrot.slane %v1286_v47, %v3251_v48 }
 0x45a   : > { %v1301_v53 = vrot.slane %v1287_v49, %v3251_v48 }
 0x45b   : > { %v1302_v55 = vcombine.low %v1278_v50, %v1294_v52  ;;  %v1303_v56 = vcombine.high %v1278_v50, %v1294_v52 }
 0x45c   : > { %v1318_v57 = vcombine.low %v1285_v51, %v1301_v53  ;;  %v1319_v58 = vcombine.high %v1285_v51, %v1301_v53 }
 0x45d   : > { %v1310_v59 = vrot.slane %v1302_v55, %v3253_v54  ;;  %v1317_v60 = vrot.slane %v1303_v56, %v3253_v54 }
 0x45e   : > { %v1326_v26 = vrot.slane %v1318_v57, %v3253_v54  ;;  %v1333_v61 = vrot.slane %v1319_v58, %v3253_v54 }
 0x45f   : > { %v1338_v62 = vcombine.low %v1310_v59, %v1317_v60  ;;  %v2560_v63 = vcombine.high %v1310_v59, %v1317_v60 }
 0x460   : > { %v1354_v0 = vcombine.low %v1326_v26, %v1333_v61  ;;  %v2561_v1 = vcombine.high %v1326_v26, %v1333_v61 }
 0x461   : > { %v2845_v2 = vpop.eup %2844  ;;  %v1345_v3 = vrot.slane %v1338_v62, %v3251_v48  ;;  %v1353_v4 = vrot.slane %v2560_v63, %v3251_v48 }
 0x462   : > { %v2847_v5 = vpop.eup %2846  ;;  %v1361_v6 = vrot.slane %v1354_v0, %v3251_v48  ;;  %v1369_v7 = vrot.slane %v2561_v1, %v3251_v48  ;;  %v1623_v8 = vsel %vm1595_vm4, %v2845_v2, 0.0  ;;  %v1637_v33 = vpack.c.bf16 %v2845_v2, %v2845_v2 }
 0x463   : > { %1624 = vadd.xlane.f32.xlu0 %v1623_v8  ;;  %v1620_v9 = vsel %vm1595_vm4, %v2847_v5, 0.0  ;;  %v1370_v11 = vcombine.low %v1345_v3, %v1353_v4  ;;  %v1371_v12 = vcombine.high %v1345_v3, %v1353_v4  ;;  %v1636_v32 = vpack.c.bf16 %v2847_v5, %v2847_v5 }
 0x464   : > { %1621 = vadd.xlane.f32.xlu1 %v1620_v9  ;;  %v1386_v13 = vcombine.low %v1361_v6, %v1369_v7  ;;  %v1387_v14 = vcombine.high %v1361_v6, %v1369_v7 }
 0x465   : > { %v1378_v15 = vrot.slane %v1370_v11, %v3253_v54  ;;  %v1385_v16 = vrot.slane %v1371_v12, %v3253_v54 }
 0x466   : > { %v1394_v17 = vrot.slane %v1386_v13, %v3253_v54  ;;  %v1401_v18 = vrot.slane %v1387_v14, %v3253_v54 }
 0x468   : > { %v1402_v19 = vcombine.low %v1378_v15, %v1394_v17  ;;  %v1403_v20 = vcombine.high %v1378_v15, %v1394_v17  ;;  %v1404_v21 = vcombine.low %v1385_v16, %v1401_v18  ;;  %v1405_v22 = vcombine.high %v1385_v16, %v1401_v18 }
 0x46a   : > { %v1406_v23 = vpack.c.bf16 %v1402_v19, %v1402_v19  ;;  %v1407_v24 = vpack.c.bf16 %v1403_v20, %v1403_v20  ;;  %v1408_v30 = vpack.c.bf16 %v1404_v21, %v1404_v21  ;;  %v1409_v31 = vpack.c.bf16 %v1405_v22, %v1405_v22 }
 0x46c   : > { %v1645_v28 = vsel %vm1643_vm5, %v1406_v23, 0  ;;  %v1691_v29 = vsel %vm1643_vm5, %v1407_v24, 0  ;;  %v1737_v34 = vsel %vm1643_vm5, %v1408_v30, 0  ;;  %v1783_v35 = vsel %vm1643_vm5, %v1409_v31, 0 }
 0x46d   : > { %2690 = vmatpush3.bf16.msra.mxu1 %v1645_v28  ;;  %2696 = vmatpush3.bf16.msra.mxu0 %v1691_v29  ;;  %v2834_v29 = vld [vmem:[%s3576_s29 + $0x10] sm:$0xff]  }
 0x46e   : > { %2701 = vmatprep.subr.bf16.mxu1 %v2964_v10  ;;  %2707 = vmatprep.subr.bf16.mxu0 %v2964_v10 }
 0x470   : > { %2692 = vmatmul.mubr.msk.bf16.vlgmr.msra.gmra.mrb[16].mxu1 %vm1595_vm4, %v1636_v32  ;;  %2698 = vmatmul.mubr.msk.bf16.vlgmr.msra.gmra.mrb[12].mxu0 %vm1595_vm4, %v1637_v33 }
 0x471   : > { %2702 = vmatpush3.bf16.msra.mxu1 %v1737_v34  ;;  %2708 = vmatpush3.bf16.msra.mxu0 %v1783_v35 }
 0x472   : > { %2703 = vmatprep.mubr.msk.bf16.mxu1 %vm2965_vm2, %v2964_v10  ;;  %2709 = vmatprep.mubr.msk.bf16.mxu0 %vm2965_vm2, %v2964_v10 }
 0x473   : > { %2713 = vmatprep.subr.bf16.mxu1 %v2964_v10  ;;  %2725 = vmatprep.subr.bf16.mxu0 %v2964_v10 }
 0x487   : > { %v1607_v36 = vpop.xlane.xlu0 %1606  ;;  %v1604_v37 = vpop.xlane.xlu1 %1603 }
 0x488   : > { %v1611_v38 = vsub.f32 %v3311_v27, %v1607_v36  ;;  %v1610_v39 = vsub.f32 %v3309_v25, %v1604_v37  ;;  %v2832_v25 = vld [vmem:[%s3576_s29] sm:$0xff]   ;;  %v2833_v27 = vld [vmem:[%s3576_s29 + $0x8] sm:$0xff]  }
 0x48a   : > { %v1618_v40 = vmul.f32 1.442695, %v1611_v38  ;;  %v1616_v41 = vmul.f32 1.442695, %v1610_v39  ;;  %v2835_v38 = vld [vmem:[%s3576_s29 + $0x18] sm:$0xff]  }
 0x48c   : > { %2848 = vpow2.f32 %v1618_v40 }
 0x48d   : > { %2850 = vpow2.f32 %v1616_v41 }
 0x496   : > { %v2849_v42 = vpop.eup %2848 }
 0x497   : > { %v2851_v43 = vpop.eup %2850  ;;  %v1629_v44 = vsel %vm1595_vm4, %v2849_v42, 0.0  ;;  %v1639_v45 = vpack.c.bf16 %v2849_v42, %v2849_v42 }
 0x498   : > { %1630 = vadd.xlane.f32.xlu0 %v1629_v44  ;;  %v1626_v46 = vsel %vm1595_vm4, %v2851_v43, 0.0  ;;  %v1638_v47 = vpack.c.bf16 %v2851_v43, %v2851_v43 }
 0x499   : > { %1627 = vadd.xlane.f32.xlu1 %v1626_v46  ;;  %2710 = vmatmul.mubr.msk.bf16.vlgmr.msra.gmra.mrb[16].mxu0 %vm1595_vm4, %v1639_v45 }
 0x49a   : > { %2704 = vmatmul.mubr.msk.bf16.vlgmr.msra.gmra.mrb[20].mxu1 %vm1595_vm4, %v1638_v47  ;;  %2729 = vmatprep.mubr.msk.bf16.mxu0 %vm2965_vm2, %v2964_v10 }
 0x49b   : > { %2721 = vmatprep.mubr.msk.bf16.mxu1 %vm2965_vm2, %v2964_v10  ;;  %2714 = vmatpush3.bf16.msra.mxu1 %v2832_v25 }
 0x49c   : > { %2715 = vmatprep.subr.bf16.mxu1 %v2964_v10 }
 0x49f   : > { %2716 = vmatpush3.bf16.msra.mxu1 %v2833_v27 }
 0x4a0   : > { %2717 = vmatprep.subr.bf16.mxu1 %v2964_v10 }
 0x4a3   : > { %2718 = vmatpush3.bf16.msra.mxu1 %v2834_v29 }
 0x4a4   : > { %2719 = vmatprep.subr.bf16.mxu1 %v2964_v10 }
 0x4a7   : > { %2720 = vmatpush3.bf16.msra.mxu1 %v2835_v38 }
 0x4f0   : > { %v1625_v58 = vpop.xlane.xlu0 %1624 }
 0x4f1   : > { %v1622_v59 = vpop.xlane.xlu1 %1621  ;;  %2852 = vrcp.f32 %v1625_v58 }
 0x4f2   : > { %2854 = vrcp.f32 %v1622_v59 }
 0x4fb   : > { %v2853_v61 = vpop.eup %2852 }
 0x4fc   : > { %v2855_v62 = vpop.eup %2854 }
 0x525   : > { %v1631_v60 = vpop.xlane.xlu0 %1630 }
 0x526   : > { %v1628_v26 = vpop.xlane.xlu1 %1627  ;;  %2856 = vrcp.f32 %v1631_v60  ;;  %v2572_v60 = vld [vmem:[%s3577_s5] ss:$0 sm:$0xff] }
 0x527   : > { %2858 = vrcp.f32 %v1628_v26 }
 0x530   : > { %v2857_v63 = vpop.eup %2856 }
 0x531   : > { %v2859_v1 = vpop.eup %2858 }
 0x543   : > { %v1681_v49 = vpop.f32.mrb[16].mxu1  ;;  %v1727_v50 = vpop.f32.mrb[12].mxu0 }
 0x544   : > { %v2693_v51 = vpop.f32.mrb[17].mxu1  ;;  %v2699_v52 = vpop.f32.mrb[13].mxu0  ;;  %v1826_v2 = vmul.f32 %v2853_v61, %v1727_v50  ;;  %v1825_v6 = vmul.f32 %v2855_v62, %v1681_v49 }
 0x545   : > { %v1684_v53 = vpop.f32.mrb[18].mxu1  ;;  %v1730_v55 = vpop.f32.mrb[14].mxu0 }
 0x546   : > { %v2694_v56 = vpop.f32.mrb[19].mxu1  ;;  %v2700_v57 = vpop.f32.mrb[15].mxu0 }
 0x56c   : > { %v1819_v0 = vpop.f32.mrb[16].mxu0 }
 0x56d   : > { %v1773_v3 = vpop.f32.mrb[20].mxu1  ;;  %v1828_v4 = vmul.f32 %v2857_v63, %v1819_v0  ;;  %v2711_v5 = vpop.f32.mrb[17].mxu0 }
 0x56e   : > { %v1827_v7 = vmul.f32 %v2859_v1, %v1773_v3  ;;  %v2705_v8 = vpop.f32.mrb[21].mxu1  ;;  %v1822_v9 = vpop.f32.mrb[18].mxu0 }
 0x56f   : > { %v1845_v11 = vcombine.low %v1826_v2, %v1828_v4  ;;  %v1846_v12 = vcombine.high %v1826_v2, %v1828_v4  ;;  %v1776_v13 = vpop.f32.mrb[22].mxu1  ;;  %v2712_v14 = vpop.f32.mrb[19].mxu0  ;;  %v2837_v8 = vld [vmem:[%s3188_s2 + $0x8] sm:$0xff]  }
 0x570   : > { %v1829_v15 = vcombine.low %v1825_v6, %v1827_v7  ;;  %v1830_v16 = vcombine.high %v1825_v6, %v1827_v7  ;;  %v2706_v17 = vpop.f32.mrb[23].mxu1  ;;  %v2836_v7 = vld [vmem:[%s3188_s2] sm:$0xff]  }
 0x571   : > { %v1853_v18 = vrot.slane %v1845_v11, %v3251_v48  ;;  %v1860_v19 = vrot.slane %v1846_v12, %v3251_v48  ;;  %2726 = vmatpush3.bf16.msra.mxu0 %v2836_v7  ;;  %v2578_v14 = vld [vmem:[%s3578_s0] ss:$0 sm:$0xff] }
 0x572   : > { %v1837_v20 = vrot.slane %v1829_v15, %v3251_v48  ;;  %v1844_v21 = vrot.slane %v1830_v16, %v3251_v48  ;;  %2727 = vmatprep.subr.bf16.mxu0 %v2964_v10  ;;  %v2579_v16 = vld [vmem:[%s730_s27] ss:$0 sm:$0xff] }
 0x574   : > { %v1861_v22 = vcombine.low %v1837_v20, %v1853_v18  ;;  %v1862_v23 = vcombine.high %v1837_v20, %v1853_v18  ;;  %v1877_v24 = vcombine.low %v1844_v21, %v1860_v19  ;;  %v1878_v28 = vcombine.high %v1844_v21, %v1860_v19  ;;  %v2838_v20 = vld [vmem:[%s3197_s14] sm:$0xff]   ;;  %v2839_v21 = vld [vmem:[%s3197_s14 + $0x8] sm:$0xff]  }
 0x575   : > { %2728 = vmatpush3.bf16.msra.mxu0 %v2837_v8  ;;  %v2591_v8 = vld [vmem:[%s3581_s13] ss:$0 sm:$0xff] (!%p2590_p1) }
 0x576   : > { %v1869_v30 = vrot.slane %v1861_v22, %v3253_v54  ;;  %v1876_v31 = vrot.slane %v1862_v23, %v3253_v54  ;;  %v1885_v32 = vrot.slane %v1877_v24, %v3253_v54  ;;  %v1892_v33 = vrot.slane %v1878_v28, %v3253_v54  ;;  %2733 = vmatprep.subr.bf16.mxu0 %v2964_v10  ;;  %v2840_v22 = vld [vmem:[%s3197_s14 + $0x10] sm:$0xff]   ;;  %v2841_v23 = vld [vmem:[%s3197_s14 + $0x18] sm:$0xff]   ;;  %v2580_v24 = vld [vmem:[%s738_s6] ss:$0 sm:$0xff] }
 0x578   : > { %v1897_v34 = vcombine.low %v1869_v30, %v1876_v31  ;;  %v2570_v35 = vcombine.high %v1869_v30, %v1876_v31  ;;  %v1913_v36 = vcombine.low %v1885_v32, %v1892_v33  ;;  %v2571_v37 = vcombine.high %v1885_v32, %v1892_v33 }
 0x57a   : > { %v1904_v39 = vrot.slane %v1897_v34, %v3251_v48  ;;  %v1912_v40 = vrot.slane %v2570_v35, %v3251_v48  ;;  %v1920_v41 = vrot.slane %v1913_v36, %v3251_v48  ;;  %v1928_v42 = vrot.slane %v2571_v37, %v3251_v48 }
 0x57c   : > { %v1930_v43 = vcombine.high %v1904_v39, %v1912_v40  ;;  %v1946_v44 = vcombine.high %v1920_v41, %v1928_v42  ;;  %v1929_v45 = vcombine.low %v1904_v39, %v1912_v40  ;;  %v1945_v46 = vcombine.low %v1920_v41, %v1928_v42 }
 0x57e   : > { %v1944_v47 = vrot.slane %v1930_v43, %v3253_v54  ;;  %v1960_v25 = vrot.slane %v1946_v44, %v3253_v54  ;;  %v1937_v27 = vrot.slane %v1929_v45, %v3253_v54  ;;  %v1953_v49 = vrot.slane %v1945_v46, %v3253_v54 }
 0x580   : > { %v1963_v50 = vcombine.low %v1944_v47, %v1960_v25  ;;  %v1962_v51 = vcombine.high %v1937_v27, %v1953_v49  ;;  %v1964_v52 = vcombine.high %v1944_v47, %v1960_v25  ;;  %v1961_v53 = vcombine.low %v1937_v27, %v1953_v49 }
 0x582   : > { %1970 = vrot.lane.b32.xlu0 %v1963_v50, %s2971_s16  ;;  %1966 = vrot.lane.b32.xlu1 %v1962_v51, %s2972_s22  ;;  %s3582_s16 = sld [smem:[#allocation28_spill]] (!%p2590_p1) }
 0x586   : > { %1974 = vrot.lane.b32.xlu1 %v1964_v52, %s2973_s3 }
 0x5f4   : > { %v1967_v48 = vpop.permute.xlu1 %1966  ;;  %v1971_v55 = vpop.permute.xlu0 %1970 }
 0x5f5   : > { %v1977_v56 = vsel %vm1410_vm3, %v1961_v53, %v1967_v48 }
 0x5f6   : > { %v1978_v58 = vsel %vm758_vm1, %v1977_v56, %v1971_v55 }
 0x5f8   : > { %v1975_v57 = vpop.permute.xlu1 %1974 }
 0x5f9   : > { %v1980_v54 = vsel %vm1979_vm6, %v1978_v58, %v1975_v57  ;;  %v2584_v57 = vld [vmem:[%s746_s15] ss:$0 sm:$0xff] }
 0x5fa   : > { %v1989_v59 = vpack.c.bf16 %v1980_v54, %v1980_v54 }
 0x5fc   : > { %2722 = vmatmul.mubr.msk.bf16.vlgmr.msra.gmra.mrb[24].mxu1 %vm2021_vm7, %v1989_v59 }
 0x6cf   : > { %v2059_v26 = vpop.f32.mrb[24].mxu1 }
 0x6d0   : > { %v3396_v61 = vadd.f32 %v2572_v60, %v2059_v26  ;;  %v2723_v62 = vpop.f32.mrb[25].mxu1 }
 0x6d1   : > { %v2062_v63 = vpop.f32.mrb[26].mxu1 }
 0x6d2   : > { %v2724_v0 = vpop.f32.mrb[27].mxu1  ;;  %v2067_v1 = vsel %vm758_vm1, %v3396_v61, 0.0 }
 0x6d3   : > { %2068 = vadd.xlane.f32.xlu1 %v2067_v1 }
 0x760   : > { %v2069_v2 = vpop.xlane.xlu1 %2068 }
 0x761   : > { %v2070_v3 = vmul.f32 0.03125, %v2069_v2 }
 0x763   : > { %v2071_v4 = vsub.f32 %v3396_v61, %v2070_v3 }
 0x765   : > { %v2072_v5 = vmul.f32 %v2071_v4, %v2071_v4 }
 0x767   : > { %v2073_v6 = vsel %vm758_vm1, %v2072_v5, 0.0 }
 0x768   : > { %2074 = vadd.xlane.f32.xlu0 %v2073_v6 }
 0x7f5   : > { %v2075_v9 = vpop.xlane.xlu0 %2074 }
 0x7f6   : > { %v2076_v11 = vmul.f32 0.03125, %v2075_v9 }
 0x7f8   : > { %v2077_v12 = vadd.f32 64.0, %v2076_v11  ;;  %v2592_v11 = vld [vmem:[%s3582_s16] ss:$0 sm:$0xff] (!%p2590_p1) }
 0x7fa   : > { %2860 = vrsqrt.f32 %v2077_v12 }
 0x804   : > { %v2861_v13 = vpop.eup %2860 }
 0x805   : > { %v2079_v15 = vmul.f32 %v2861_v13, %v2071_v4 }
 0x807   : > { %v2086_v17 = vmul.f32 %v2578_v14, %v2079_v15 }
 0x809   : > { %v2093_v18 = vadd.f32 %v2579_v16, %v2086_v17 }
 0x80b   : > { %v2098_v19 = vpack.c.bf16 %v2093_v18, %v2093_v18 }
 0x80d   : > { %2730 = vmatmul.mubr.msk.bf16.vlgmr.msra.gmra.mrb[20].mxu0 %vm758_vm1, %v2098_v19 }
 0x80e   : > { %2741 = vmatprep.mubr.msk.bf16.mxu0 %vm2965_vm2, %v2964_v10  ;;  %2734 = vmatpush3.bf16.msra.mxu0 %v2838_v20 }
 0x80f   : > { %2735 = vmatprep.subr.bf16.mxu0 %v2964_v10 }
 0x812   : > { %2736 = vmatpush3.bf16.msra.mxu0 %v2839_v21 }
 0x813   : > { %2737 = vmatprep.subr.bf16.mxu0 %v2964_v10 }
 0x816   : > { %2738 = vmatpush3.bf16.msra.mxu0 %v2840_v22 }
 0x817   : > { %2739 = vmatprep.subr.bf16.mxu0 %v2964_v10 }
 0x81a   : > { %2740 = vmatpush3.bf16.msra.mxu0 %v2841_v23 }
 0x8e0   : > { %v2155_v28 = vpop.f32.mrb[20].mxu0 }
 0x8e1   : > { %v2156_v29 = vadd.f32 %v2580_v24, %v2155_v28  ;;  %v2731_v30 = vpop.f32.mrb[21].mxu0 }
 0x8e2   : > { %v2158_v31 = vpop.f32.mrb[22].mxu0 }
 0x8e3   : > { %v2162_v32 = vmul.f32 0.70710677, %v2156_v29  ;;  %v2732_v33 = vpop.f32.mrb[23].mxu0  ;;  %v2161_v53 = vmul.f32 0.5, %v2156_v29 }
 0x8e5   : > { %v2163_v34 = vand.u32 2147483647, %v2162_v32  ;;  %vm2182_vm8 = vcmp.lt.f32.partialorder %v2162_v32, 0.0 }
 0x8e7   : > { %v2164_v35 = vmul.f32 0.3275911, %v2163_v34  ;;  %v2176_v37 = vsub.f32 0.0, %v2163_v34 }
 0x8e9   : > { %v2165_v36 = vadd.f32 1.0, %v2164_v35  ;;  %v2177_v10 = vmul.f32 %v2176_v37, %v2163_v34 }
 0x8eb   : > { %2862 = vrcp.f32 %v2165_v36  ;;  %v2178_v41 = vmul.f32 1.442695, %v2177_v10 }
 0x8ed   : > { %2864 = vpow2.f32 %v2178_v41 }
 0x8f5   : > { %v2863_v38 = vpop.eup %2862 }
 0x8f6   : > { %v2167_v39 = vmul.f32 1.0614054, %v2863_v38 }
 0x8f7   : > { %v2865_v27 = vpop.eup %2864 }
 0x8f8   : > { %v2168_v40 = vadd.f32 -1.4531521, %v2167_v39 }
 0x8fa   : > { %v2169_v42 = vmul.f32 %v2863_v38, %v2168_v40 }
 0x8fc   : > { %v2170_v43 = vadd.f32 1.4214138, %v2169_v42 }
 0x8fe   : > { %v2171_v44 = vmul.f32 %v2863_v38, %v2170_v43 }
 0x900   : > { %v2172_v45 = vadd.f32 -0.28449672, %v2171_v44 }
 0x902   : > { %v2173_v46 = vmul.f32 %v2863_v38, %v2172_v45 }
 0x904   : > { %v2174_v47 = vadd.f32 0.2548296, %v2173_v46 }
 0x906   : > { %v2175_v25 = vmul.f32 %v2863_v38, %v2174_v47 }
 0x908   : > { %v2180_v49 = vmul.f32 %v2865_v27, %v2175_v25 }
 0x90a   : > { %v2181_v50 = vsub.f32 1.0, %v2180_v49 }
 0x90c   : > { %v2183_v51 = vsub.f32 0.0, %v2181_v50 }
 0x90e   : > { %v2184_v52 = vsel %vm2182_vm8, %v2183_v51, %v2181_v50 }
 0x90f   : > { %v2185_v48 = vadd.f32 1.0, %v2184_v52 }
 0x911   : > { %v2186_v55 = vmul.f32 %v2185_v48, %v2161_v53 }
 0x913   : > { %v2195_v56 = vpack.c.bf16 %v2186_v55, %v2186_v55 }
 0x915   : > { %2742 = vmatmul.mubr.msk.bf16.vlgmr.msra.gmra.mrb[24].mxu0 %vm2021_vm7, %v2195_v56 }
 0x9e7   : > { %2275 = sbr.rel (%p2590_p1) target bundleno = 2855 (0xb27), region = 92 }
 0x9e8   : > { %v2264_v58 = vpop.f32.mrb[24].mxu0 }
 0x9e9   : > { %v2265_v54 = vadd.f32 %v2584_v57, %v2264_v58  ;;  %v2743_v59 = vpop.f32.mrb[25].mxu0 }
 0x9ea   : > { %v2267_v60 = vpop.f32.mrb[26].mxu0 }
 0x9eb   : > { %v2270_v26 = vadd.f32 %v2265_v54, %v3396_v61  ;;  %v2744_v62 = vpop.f32.mrb[27].mxu0 }
 0x9ed   : > { %2271 = vst.msk [vmem:[#allocation2] sm:$0xff] %vm758_vm1, %v2270_v26  ;;  %v2278_v63 = vsel (!%p2590_p1), %vm758_vm1, %v2270_v26, 0.0 }
 0x9ee   : > { %2279 = vadd.xlane.f32.xlu0 %v2278_v63 }
 0xa7b   : > { %v2280_v0 = vpop.xlane.xlu0 %2279 }
 0xa7c   : > { %v2281_v1 = vmul.f32 0.03125, %v2280_v0 }
 0xa7e   : > { %v2282_v2 = vsub.f32 %v2270_v26, %v2281_v1 }
 0xa80   : > { %v2283_v3 = vmul.f32 %v2282_v2, %v2282_v2 }
 0xa82   : > { %v2284_v4 = vsel %vm758_vm1, %v2283_v3, 0.0 }
 0xa83   : > { %2285 = vadd.xlane.f32.xlu0 %v2284_v4 }
 0xb10   : > { %v2286_v5 = vpop.xlane.xlu0 %2285 }
 0xb11   : > { %v2287_v6 = vmul.f32 0.03125, %v2286_v5 }
 0xb13   : > { %v2288_v61 = vadd.f32 1e-05, %v2287_v6 }
 0xb15   : > { %2866 = vrsqrt.f32 %v2288_v61 }
 0xb1f   : > { %v2867_v7 = vpop.eup %2866 }
 0xb20   : > { %v2290_v9 = vmul.f32 %v2867_v7, %v2282_v2 }
 0xb22   : > { %v2297_v12 = vmul.f32 %v2591_v8, %v2290_v9 }
 0xb24   : > { %v2304_v13 = vadd.f32 %v2592_v11, %v2297_v12 }
 0xb26   : > { %2305 = vst.msk [vmem:[%s691_s4] sm:$0xff] %vm758_vm1, %v2304_v13 }
 0xb27 PF: > { %s3583_s22 = sld [smem:[#allocation10_spill]]  ;;  %s3584_s3 = sld [smem:[#allocation7_spill]] }
 0xb28   : > { %s3586_s25 = sld [smem:[#allocation29_spill]]  ;;  %s2320_s23 = sshll.u32 %s691_s4, 4  ;;  %s2321_s23 = int_to_ptr.vmem [resolvable:$true] %s2320_s23 }
 0xb29   : > { %s2868_s6 = scalar_lea.vmem %s2321_s23, 128  ;;  %s2974_s14 = smov [#allocation3]  }
 0xb2a   : > { %p2869_p2 = scmp.ne.s32.totalorder %s2321_s23, %s2868_s6  ;;  %s2872_s18 = sshll.u32 %s2974_s14, 4  ;;  %s2873_s18 = int_to_ptr.vmem [resolvable:$false] %s2872_s18 }
 0xb2b   : > { %s2874_s17 = scalar_lea.vmem %s2873_s18, 256  ;;  %p2875_p6 = scmp.lt.s32.totalorder %s2321_s23, %s2873_s18 }
 0xb2c   : > { %p2870_p4 = pnand %p2869_p2, %p3109_p3  ;;  %p2876_p7 = scmp.lt.s32.totalorder %s2874_s17, %s2868_s6 }
 0xb2d   : > { %s2594_s19 = sshll.u32 %s3583_s22, 7  ;;  %s3588_s27 = sand.u32 1, %s3584_s3  }
 0xb2e   : > { %s3587_s0 = smov %s3586_s25  ;;  %s3455_s2 = scalar_lea.hbm %s3586_s25, %s2594_s19 }
 0xb2f   : > { %s2307_s30 = scalar_lea.sflag [#allocation4], %s3588_s27  ;;  %p2871_p5 = pneg %p2870_p4 }
 0xb30   : > { %p2877_p8 = por %p2876_p7, %p2875_p6 }
 0xb32   : > { %p2878_p10 = pnand %p2877_p8, %p2871_p5 }
 0xb34   : > { %2881 = shalt.err (!%p2878_p10)
}
 0xb35   : > { %s2882_s26 = scalar_lea.hbm %s3455_s2, 128  ;;  %s2886_s15 = scalar_lea.hbm %s3587_s0, 256 }
 0xb36   : > { %p2883_p11 = scmp.ne.s32.totalorder %s3455_s2, %s2882_s26  ;;  %p2887_p0 = scmp.lt.u32.totalorder %s3455_s2, %s3587_s0 }
 0xb37   : > { %p2888_p1 = scmp.lt.u32.totalorder %s2886_s15, %s2882_s26  ;;  %p2890_p4 = scmp.lt.u32.totalorder %s2882_s26, %s3455_s2 }
 0xb38   : > { %p2884_p12 = pnand %p2883_p11, %p3109_p3 }
 0xb39   : > { %p2889_p2 = por %p2888_p1, %p2887_p0 }
 0xb3a   : > { %p2885_p13 = pneg %p2884_p12 }
 0xb3b   : > { %p2891_p5 = por %p2890_p4, %p2889_p2 }
 0xb3d   : > { %p2892_p6 = pnand %p2891_p5, %p2885_p13 }
 0xb3f   : > { %2895 = shalt.err (!%p2892_p6)
}
 0xb40   : > { %2745 = dma.vmem_to_hbm [thread:$0]  (%p3109_p3), %s2321_s23, 128, %s3455_s2, %s2307_s30  }
 0xb41 PF: > { %s3589_s29 = sld [smem:[#allocation13_spill]]  ;;  %s3590_s16 = sld [smem:[#allocation6_spill]] }
 0xb47   : > { %p2751_p7 = scmp.ge.s32.totalorder %s3589_s29, 2  ;;  %s2332_s3 = sand.u32 1, %s3590_s16  }
 0xb48   : > { %s2333_s19 = scalar_lea.sflag [#allocation4], %s2332_s3 }
 0xb49   : > { %p2748_p8 = pnand %p2751_p7, %p3119_p9 }
 0xb4b   : > { %2929 = dma.done.wait (!%p2748_p8), %s2333_s19, 128  }
 0xb4c   : > { %2931 = vsyncadd (!%p2748_p8), %s2333_s19, 4294967168  ;;  %s29_s28 = sadd.s32 1, %s3589_s29   ;;  %s3592_s21 = sld [smem:[#allocation7_spill]] }
 0xb4d   : > { %p26_p10 = scmp.ge.s32.totalorder %s29_s28, 6   ;;  %s3593_s22 = sld [smem:[#allocation8_spill]] }
 0xb4e   : > { %s3594_s23 = sld [smem:[#allocation18_spill]]  ;;  %s3595_s24 = sld [smem:[#allocation11_spill]] }
 0xb4f   : > { %s3596_s25 = sld [smem:[#allocation12_spill]]  ;;  %s3597_s26 = sld [smem:[#allocation14_spill]] }
 0xb50   : > { %s3598_s27 = sld [smem:[#allocation16_spill]]  ;;  %28 = sbr.rel (!%p26_p10) target bundleno = 16 (0x10), region = 166 }
 0xb57   :  { %2338 = vsyncpa [#allocation4], 1 }
 0xb58   :  { %2340 = vsyncpa [#allocation4 + $0x1], 1 }

</bundles_post_ra>
